<compile_context>
chip_gen: v7x
topology: tpu7x:2x2x1
jax: 0.10.0
libtpu: 0.0.40
codegen_flags: <defaults>
</compile_context>

<pallas_src>
import functools

import jax
import jax.numpy as jnp
from jax import lax
from jax.experimental import pallas as pl
from jax.experimental.pallas import tpu as pltpu


# ---------------------------------------------------------------------------
# Kernel 1: fused bilinear 2x upsample -> 3x3 'same' conv (+bias), plus per-batch-element
# channel sums / sums-of-squares for BatchNorm.
# ---------------------------------------------------------------------------
def _lane_roll(v, shift):
    """Circular roll of the last (lane) axis toward higher indices (jnp.roll semantics).

    Built from static slices + concatenate, which Mosaic lowers to a lane rotate.
    """
    n = v.shape[-1]
    s = shift % n
    if s == 0:
        return v
    return jnp.concatenate([v[..., n - s:], v[..., :n - s]], axis=-1)


def upconv_stats_kernel(x_ref, up_ref, mask_ref, w_ref, b_ref, y_ref, stats_ref, *, hu, wu):
    # x_ref:     (1, Cin, H*W)      input block, spatially flattened (lane-dense)
    # up_ref:    (H*W, Hu*Wu)       transposed Kronecker bilinear-upsample operator (constant)
    # mask_ref:  (9, Hu*Wu)         per-tap validity masks (zero padding of the 'same' conv)
    # w_ref:     (9, Cout, Cin)     conv weights, tap-major (t = ky*3 + kx)
    # b_ref:     (Cout, 1)          conv bias
    # y_ref:     (1, Cout, Hu*Wu)   conv output (pre-BN), lane-dense
    # stats_ref: (1, 2, Cout)       per-batch-element [sum; sum of squares] over Hu*Wu
    cin = x_ref.shape[1]
    cout = y_ref.shape[1]
    hw = hu * wu

    # --- bilinear 2x upsample of all channels straight into flat (Cin, Hu*Wu) layout ---
    # Column-chunk the constant operator so each MXU dot's RHS slice stays at ~32 vregs.
    chunk = 128 if hw % 128 == 0 else hw
    u_parts = []
    for j in range(hw // chunk):
        u_parts.append(
            jnp.dot(x_ref[0], up_ref[:, j * chunk:(j + 1) * chunk],
                    preferred_element_type=jnp.float32))
    u = jnp.concatenate(u_parts, axis=-1) if len(u_parts) > 1 else u_parts[0]  # (Cin, Hu*Wu)

    # --- 3x3 conv as 9 tap-shifted channel contractions on the MXU ---
    # Single lane-dense (Cout, Hu*Wu) f32 accumulator (8 vregs at these shapes).
    acc = jnp.zeros((cout, hw), jnp.float32)
    for t in range(9):
        dy, dx = t // 3 - 1, t % 3 - 1
        off = dy * wu + dx
        shifted = _lane_roll(u, (-off) % hw)          # XLU lane rotate (cheap, off-VALU)
        masked = shifted * mask_ref[t, :]             # zero the 'same'-padding taps
        acc = acc + jnp.dot(w_ref[t], masked, preferred_element_type=jnp.float32)

    y = acc + b_ref[...]                              # (Cout, Hu*Wu) + (Cout, 1) broadcast
    y_ref[0] = y                                      # unmasked, fully lane-dense stores

    # --- vectorised BN statistics: one lane reduction per moment ---
    stats_ref[0, 0, :] = jnp.sum(y, axis=1)
    stats_ref[0, 1, :] = jnp.sum(y * y, axis=1)


# ---------------------------------------------------------------------------
# Kernel 2: elementwise batch-norm (precomputed per-channel scale/shift) + ReLU.
# Single grid step over the whole tensor; output aliased onto the input buffer.
# ---------------------------------------------------------------------------
def bn_relu_kernel(y_ref, scale_ref, shift_ref, o_ref):
    o_ref[...] = jnp.maximum(y_ref[...] * scale_ref[...] + shift_ref[...], jnp.float32(0.0))


# ---------------------------------------------------------------------------
# JAX glue: constant operators, BN scalar math, parameter reshapes.
# ---------------------------------------------------------------------------
def _upsample_matrix(n_in):
    """(2*n_in, n_in) operator reproducing torch bilinear 2x (align_corners=False) on one axis."""
    n_out = 2 * n_in
    src = (jnp.arange(n_out, dtype=jnp.float32) + 0.5) / 2.0 - 0.5
    src = jnp.maximum(src, 0.0)
    lo = jnp.minimum(jnp.floor(src).astype(jnp.int32), n_in - 1)
    hi = jnp.minimum(lo + 1, n_in - 1)
    frac = src - lo.astype(jnp.float32)
    return (jax.nn.one_hot(lo, n_in, dtype=jnp.float32) * (1.0 - frac)[:, None]
            + jax.nn.one_hot(hi, n_in, dtype=jnp.float32) * frac[:, None])


def _tap_masks(hu, wu):
    """(9, hu*wu) 0/1 masks: tap (dy,dx) is valid iff (h+dy, w+dx) lies inside the image."""
    p = jnp.arange(hu * wu, dtype=jnp.int32)
    h, w = p // wu, p % wu
    rows = []
    for t in range(9):
        dy, dx = t // 3 - 1, t % 3 - 1
        valid = (h + dy >= 0) & (h + dy < hu) & (w + dx >= 0) & (w + dx < wu)
        rows.append(valid.astype(jnp.float32))
    return jnp.stack(rows, axis=0)


def up_conv_forward(x_nchw, w, b, gamma, beta, eps=1e-5):
    N, Cin, H, W = x_nchw.shape
    Cout = w.shape[0]
    Hu, Wu = 2 * H, 2 * W
    HW = Hu * Wu

    x_flat = x_nchw.astype(jnp.float32).reshape(N, Cin, H * W)
    # Transposed Kronecker bilinear-upsample operator: (H*W, Hu*Wu).  Grid-invariant (~1 MiB f32
    # at 16x16 -> 32x32); fetched into VMEM once.
    up_t = jnp.kron(_upsample_matrix(H), _upsample_matrix(W)).T
    masks = _tap_masks(Hu, Wu)                                              # (9, Hu*Wu)
    w_taps = jnp.transpose(w.astype(jnp.float32).reshape(Cout, Cin, 9), (2, 0, 1))  # (9, Cout, Cin)
    b_col = b.astype(jnp.float32).reshape(Cout, 1)

    kernel1 = functools.partial(upconv_stats_kernel, hu=Hu, wu=Wu)
    conv_out, stats = pl.pallas_call(
        kernel1,
        out_shape=(
            jax.ShapeDtypeStruct((N, Cout, HW), jnp.float32),
            jax.ShapeDtypeStruct((N, 2, Cout), jnp.float32),
        ),
        grid_spec=pltpu.PrefetchScalarGridSpec(
            num_scalar_prefetch=0,
            grid=(N,),
            in_specs=[
                pl.BlockSpec((1, Cin, H * W), lambda i: (i, 0, 0)),
                pl.BlockSpec((H * W, HW), lambda i: (0, 0)),
                pl.BlockSpec((9, HW), lambda i: (0, 0)),
                pl.BlockSpec((9, Cout, Cin), lambda i: (0, 0, 0)),
                pl.BlockSpec((Cout, 1), lambda i: (0, 0)),
            ],
            out_specs=(
                pl.BlockSpec((1, Cout, HW), lambda i: (i, 0, 0)),
                pl.BlockSpec((1, 2, Cout), lambda i: (i, 0, 0)),
            ),
        ),
        compiler_params=pltpu.CompilerParams(
            dimension_semantics=("parallel",),
            vmem_limit_bytes=32 * 1024 * 1024,
        ),
    )(x_flat, up_t, masks, w_taps, b_col)

    # Training-mode BatchNorm statistics (biased variance) -- tiny scalar math in JAX.
    # (E[x^2] - E[x]^2 clamped at 0; fine at these magnitudes.)
    cnt = jnp.float32(N * HW)
    ssum = jnp.sum(stats, axis=0)                   # (2, Cout)
    mean = ssum[0] / cnt
    var = jnp.maximum(ssum[1] / cnt - mean * mean, 0.0)
    invstd = lax.rsqrt(var + eps)
    g = gamma.astype(jnp.float32)
    scale = (g * invstd).reshape(1, Cout, 1)
    shift = (beta.astype(jnp.float32) - mean * g * invstd).reshape(1, Cout, 1)

    # Single-step, whole-tensor BN-apply + ReLU (64 KiB at test shapes), aliased in place.
    out = pl.pallas_call(
        bn_relu_kernel,
        out_shape=jax.ShapeDtypeStruct((N, Cout, HW), jnp.float32),
        grid_spec=pltpu.PrefetchScalarGridSpec(
            num_scalar_prefetch=0,
            grid=(1,),
            in_specs=[
                pl.BlockSpec((N, Cout, HW), lambda i: (0, 0, 0)),
                pl.BlockSpec((1, Cout, 1), lambda i: (0, 0, 0)),
                pl.BlockSpec((1, Cout, 1), lambda i: (0, 0, 0)),
            ],
            out_specs=pl.BlockSpec((N, Cout, HW), lambda i: (0, 0, 0)),
        ),
        input_output_aliases={0: 0},
        compiler_params=pltpu.CompilerParams(
            dimension_semantics=("arbitrary",),
        ),
    )(conv_out, scale, shift)

    return out.reshape(N, Cout, Hu, Wu)             # NCHW; reshape is free


# ---------------------------------------------------------------------------
# Pure-JAX reference (same semantics) for a correctness sanity check.
# ---------------------------------------------------------------------------
def _linear_idx_weights(n_out, n_in):
    src = (jnp.arange(n_out, dtype=jnp.float32) + 0.5) / 2.0 - 0.5
    src = jnp.maximum(src, 0.0)
    lo = jnp.minimum(jnp.floor(src).astype(jnp.int32), n_in - 1)
    hi = jnp.minimum(lo + 1, n_in - 1)
    frac = src - lo.astype(jnp.float32)
    return lo, hi, frac


def bilinear_upsample_2x(x):  # x: NCHW
    N, C, H, W = x.shape
    lo_h, hi_h, fh = _linear_idx_weights(2 * H, H)
    lo_w, hi_w, fw = _linear_idx_weights(2 * W, W)
    fh = fh.reshape(1, 1, 2 * H, 1)
    fw = fw.reshape(1, 1, 1, 2 * W)
    xh = jnp.take(x, lo_h, axis=2) * (1.0 - fh) + jnp.take(x, hi_h, axis=2) * fh
    return jnp.take(xh, lo_w, axis=3) * (1.0 - fw) + jnp.take(xh, hi_w, axis=3) * fw


def up_conv_reference(x_nchw, w, b, gamma, beta, eps=1e-5):
    Cout = w.shape[0]
    up = bilinear_upsample_2x(x_nchw.astype(jnp.float32))
    x_nhwc = jnp.transpose(up, (0, 2, 3, 1))
    w_hwio = jnp.transpose(w.astype(jnp.float32), (2, 3, 1, 0))
    y = lax.conv_general_dilated(
        x_nhwc, w_hwio, window_strides=(1, 1), padding="SAME",
        dimension_numbers=("NHWC", "HWIO", "NHWC"),
        precision=lax.Precision.HIGHEST,
    ) + b.reshape(1, 1, 1, Cout)
    mean = jnp.mean(y, axis=(0, 1, 2))
    var = jnp.mean((y - mean) ** 2, axis=(0, 1, 2))
    yhat = jnp.maximum((y - mean) / jnp.sqrt(var + eps) * gamma + beta, 0.0)
    return jnp.transpose(yhat, (0, 3, 1, 2))


if __name__ == "__main__":
    key = jax.random.PRNGKey(0)
    k_x, k_w, k_b = jax.random.split(key, 3)

    N, in_ch, H, W = 2, 4, 16, 16
    out_ch = 8

    x = jax.random.normal(k_x, (N, in_ch, H, W), dtype=jnp.float32)
    w = 0.1 * jax.random.normal(k_w, (out_ch, in_ch, 3, 3), dtype=jnp.float32)
    b = 0.1 * jax.random.normal(k_b, (out_ch,), dtype=jnp.float32)
    gamma = jnp.ones((out_ch,), jnp.float32)   # PyTorch BatchNorm2d default affine init
    beta = jnp.zeros((out_ch,), jnp.float32)

    out = jax.jit(up_conv_forward)(x, w, b, gamma, beta)
    out = jax.block_until_ready(out)

    ref = up_conv_reference(x, w, b, gamma, beta)
    assert out.shape == (N, out_ch, 2 * H, 2 * W)
    assert jnp.allclose(out, ref, atol=2e-3, rtol=2e-3), float(jnp.max(jnp.abs(out - ref)))

    print("KERNEL_OK")
</pallas_src>

<mosaic_0001>
module attributes {stable_mosaic.version = 11 : i64} {
  func.func @upconv_stats_kernel(%arg0: i32, %arg1: memref<1x4x256xf32, #tpu.memory_space<vmem>>, %arg2: memref<256x1024xf32, #tpu.memory_space<vmem>>, %arg3: memref<9x1024xf32, #tpu.memory_space<vmem>>, %arg4: memref<9x8x4xf32, #tpu.memory_space<vmem>>, %arg5: memref<8x1xf32, #tpu.memory_space<vmem>>, %arg6: memref<1x8x1024xf32, #tpu.memory_space<vmem>>, %arg7: memref<1x2x8xf32, #tpu.memory_space<vmem>>) attributes {dimension_semantics = [#tpu.dimension_semantics<parallel>], iteration_bounds = array<i64: 2>, scalar_prefetch = 0 : i64, scratch_operands = 0 : i64, tpu.core_type = #tpu.core_type<tc>, window_params = [{transform_indices = @transform_0, window_bounds = array<i64: 1, 4, 256>}, {pipeline_mode = #tpu.pipeline_mode<synchronous>, transform_indices = @transform_1, window_bounds = array<i64: 256, 1024>}, {pipeline_mode = #tpu.pipeline_mode<synchronous>, transform_indices = @transform_2, window_bounds = array<i64: 9, 1024>}, {pipeline_mode = #tpu.pipeline_mode<synchronous>, transform_indices = @transform_3, window_bounds = array<i64: 9, 8, 4>}, {pipeline_mode = #tpu.pipeline_mode<synchronous>, transform_indices = @transform_4, window_bounds = array<i64: 8, 1>}, {transform_indices = @transform_5, window_bounds = array<i64: 1, 8, 1024>}, {transform_indices = @transform_6, window_bounds = array<i64: 1, 2, 8>}]} {
    %c0 = arith.constant 0 : index
    %c0_0 = arith.constant 0 : index
    %c0_1 = arith.constant 0 : index
    %0 = vector.load %arg1[%c0, %c0_0, %c0_1] : memref<1x4x256xf32, #tpu.memory_space<vmem>>, vector<1x4x256xf32>
    %1 = vector.shape_cast %0 : vector<1x4x256xf32> to vector<4x256xf32>
    %c0_2 = arith.constant 0 : index
    %c0_3 = arith.constant 0 : index
    %2 = vector.load %arg2[%c0_2, %c0_3] : memref<256x1024xf32, #tpu.memory_space<vmem>>, vector<256x128xf32>
    %cst = arith.constant dense<0.000000e+00> : vector<4x128xf32>
    %3 = tpu.matmul %1, %2, %cst {dimension_numbers = #tpu.dot_dimension_numbers<[1], [0], [0], [1], [0, 0, 1, 1], [], []>} : vector<4x256xf32>, vector<256x128xf32>, vector<4x128xf32> -> vector<4x128xf32>
    %c0_4 = arith.constant 0 : index
    %c0_5 = arith.constant 0 : index
    %c0_6 = arith.constant 0 : index
    %4 = vector.load %arg1[%c0_4, %c0_5, %c0_6] : memref<1x4x256xf32, #tpu.memory_space<vmem>>, vector<1x4x256xf32>
    %5 = vector.shape_cast %4 : vector<1x4x256xf32> to vector<4x256xf32>
    %c0_7 = arith.constant 0 : index
    %c128 = arith.constant 128 : index
    %6 = vector.load %arg2[%c0_7, %c128] : memref<256x1024xf32, #tpu.memory_space<vmem>>, vector<256x128xf32>
    %cst_8 = arith.constant dense<0.000000e+00> : vector<4x128xf32>
    %7 = tpu.matmul %5, %6, %cst_8 {dimension_numbers = #tpu.dot_dimension_numbers<[1], [0], [0], [1], [0, 0, 1, 1], [], []>} : vector<4x256xf32>, vector<256x128xf32>, vector<4x128xf32> -> vector<4x128xf32>
    %c0_9 = arith.constant 0 : index
    %c0_10 = arith.constant 0 : index
    %c0_11 = arith.constant 0 : index
    %8 = vector.load %arg1[%c0_9, %c0_10, %c0_11] : memref<1x4x256xf32, #tpu.memory_space<vmem>>, vector<1x4x256xf32>
    %9 = vector.shape_cast %8 : vector<1x4x256xf32> to vector<4x256xf32>
    %c0_12 = arith.constant 0 : index
    %c256 = arith.constant 256 : index
    %10 = vector.load %arg2[%c0_12, %c256] : memref<256x1024xf32, #tpu.memory_space<vmem>>, vector<256x128xf32>
    %cst_13 = arith.constant dense<0.000000e+00> : vector<4x128xf32>
    %11 = tpu.matmul %9, %10, %cst_13 {dimension_numbers = #tpu.dot_dimension_numbers<[1], [0], [0], [1], [0, 0, 1, 1], [], []>} : vector<4x256xf32>, vector<256x128xf32>, vector<4x128xf32> -> vector<4x128xf32>
    %c0_14 = arith.constant 0 : index
    %c0_15 = arith.constant 0 : index
    %c0_16 = arith.constant 0 : index
    %12 = vector.load %arg1[%c0_14, %c0_15, %c0_16] : memref<1x4x256xf32, #tpu.memory_space<vmem>>, vector<1x4x256xf32>
    %13 = vector.shape_cast %12 : vector<1x4x256xf32> to vector<4x256xf32>
    %c0_17 = arith.constant 0 : index
    %c384 = arith.constant 384 : index
    %14 = vector.load %arg2[%c0_17, %c384] : memref<256x1024xf32, #tpu.memory_space<vmem>>, vector<256x128xf32>
    %cst_18 = arith.constant dense<0.000000e+00> : vector<4x128xf32>
    %15 = tpu.matmul %13, %14, %cst_18 {dimension_numbers = #tpu.dot_dimension_numbers<[1], [0], [0], [1], [0, 0, 1, 1], [], []>} : vector<4x256xf32>, vector<256x128xf32>, vector<4x128xf32> -> vector<4x128xf32>
    %c0_19 = arith.constant 0 : index
    %c0_20 = arith.constant 0 : index
    %c0_21 = arith.constant 0 : index
    %16 = vector.load %arg1[%c0_19, %c0_20, %c0_21] : memref<1x4x256xf32, #tpu.memory_space<vmem>>, vector<1x4x256xf32>
    %17 = vector.shape_cast %16 : vector<1x4x256xf32> to vector<4x256xf32>
    %c0_22 = arith.constant 0 : index
    %c512 = arith.constant 512 : index
    %18 = vector.load %arg2[%c0_22, %c512] : memref<256x1024xf32, #tpu.memory_space<vmem>>, vector<256x128xf32>
    %cst_23 = arith.constant dense<0.000000e+00> : vector<4x128xf32>
    %19 = tpu.matmul %17, %18, %cst_23 {dimension_numbers = #tpu.dot_dimension_numbers<[1], [0], [0], [1], [0, 0, 1, 1], [], []>} : vector<4x256xf32>, vector<256x128xf32>, vector<4x128xf32> -> vector<4x128xf32>
    %c0_24 = arith.constant 0 : index
    %c0_25 = arith.constant 0 : index
    %c0_26 = arith.constant 0 : index
    %20 = vector.load %arg1[%c0_24, %c0_25, %c0_26] : memref<1x4x256xf32, #tpu.memory_space<vmem>>, vector<1x4x256xf32>
    %21 = vector.shape_cast %20 : vector<1x4x256xf32> to vector<4x256xf32>
    %c0_27 = arith.constant 0 : index
    %c640 = arith.constant 640 : index
    %22 = vector.load %arg2[%c0_27, %c640] : memref<256x1024xf32, #tpu.memory_space<vmem>>, vector<256x128xf32>
    %cst_28 = arith.constant dense<0.000000e+00> : vector<4x128xf32>
    %23 = tpu.matmul %21, %22, %cst_28 {dimension_numbers = #tpu.dot_dimension_numbers<[1], [0], [0], [1], [0, 0, 1, 1], [], []>} : vector<4x256xf32>, vector<256x128xf32>, vector<4x128xf32> -> vector<4x128xf32>
    %c0_29 = arith.constant 0 : index
    %c0_30 = arith.constant 0 : index
    %c0_31 = arith.constant 0 : index
    %24 = vector.load %arg1[%c0_29, %c0_30, %c0_31] : memref<1x4x256xf32, #tpu.memory_space<vmem>>, vector<1x4x256xf32>
    %25 = vector.shape_cast %24 : vector<1x4x256xf32> to vector<4x256xf32>
    %c0_32 = arith.constant 0 : index
    %c768 = arith.constant 768 : index
    %26 = vector.load %arg2[%c0_32, %c768] : memref<256x1024xf32, #tpu.memory_space<vmem>>, vector<256x128xf32>
    %cst_33 = arith.constant dense<0.000000e+00> : vector<4x128xf32>
    %27 = tpu.matmul %25, %26, %cst_33 {dimension_numbers = #tpu.dot_dimension_numbers<[1], [0], [0], [1], [0, 0, 1, 1], [], []>} : vector<4x256xf32>, vector<256x128xf32>, vector<4x128xf32> -> vector<4x128xf32>
    %c0_34 = arith.constant 0 : index
    %c0_35 = arith.constant 0 : index
    %c0_36 = arith.constant 0 : index
    %28 = vector.load %arg1[%c0_34, %c0_35, %c0_36] : memref<1x4x256xf32, #tpu.memory_space<vmem>>, vector<1x4x256xf32>
    %29 = vector.shape_cast %28 : vector<1x4x256xf32> to vector<4x256xf32>
    %c0_37 = arith.constant 0 : index
    %c896 = arith.constant 896 : index
    %30 = vector.load %arg2[%c0_37, %c896] : memref<256x1024xf32, #tpu.memory_space<vmem>>, vector<256x128xf32>
    %cst_38 = arith.constant dense<0.000000e+00> : vector<4x128xf32>
    %31 = tpu.matmul %29, %30, %cst_38 {dimension_numbers = #tpu.dot_dimension_numbers<[1], [0], [0], [1], [0, 0, 1, 1], [], []>} : vector<4x256xf32>, vector<256x128xf32>, vector<4x128xf32> -> vector<4x128xf32>
    %32 = tpu.concatenate %3, %7, %11, %15, %19, %23, %27, %31 in 1 : vector<4x128xf32>, vector<4x128xf32>, vector<4x128xf32>, vector<4x128xf32>, vector<4x128xf32>, vector<4x128xf32>, vector<4x128xf32>, vector<4x128xf32> -> vector<4x1024xf32>
    %cst_39 = arith.constant 0.000000e+00 : f32
    %33 = vector.broadcast %cst_39 : f32 to vector<8x1024xf32>
    %34 = vector.extract_strided_slice %32 {offsets = [0, 991], sizes = [4, 33], strides = [1, 1]} : vector<4x1024xf32> to vector<4x33xf32>
    %35 = vector.extract_strided_slice %32 {offsets = [0, 0], sizes = [4, 991], strides = [1, 1]} : vector<4x1024xf32> to vector<4x991xf32>
    %36 = tpu.concatenate %34, %35 in 1 : vector<4x33xf32>, vector<4x991xf32> -> vector<4x1024xf32>
    %c0_40 = arith.constant 0 : index
    %c0_41 = arith.constant 0 : index
    %37 = vector.load %arg3[%c0_40, %c0_41] : memref<9x1024xf32, #tpu.memory_space<vmem>>, vector<1x1024xf32>
    %38 = vector.shape_cast %37 : vector<1x1024xf32> to vector<1024xf32>
    %39 = vector.shape_cast %38 : vector<1024xf32> to vector<1x1024xf32>
    %40 = vector.broadcast %39 : vector<1x1024xf32> to vector<4x1024xf32>
    %41 = arith.mulf %36, %40 : vector<4x1024xf32>
    %c0_42 = arith.constant 0 : index
    %c0_43 = arith.constant 0 : index
    %c0_44 = arith.constant 0 : index
    %42 = vector.load %arg4[%c0_42, %c0_43, %c0_44] : memref<9x8x4xf32, #tpu.memory_space<vmem>>, vector<1x8x4xf32>
    %43 = vector.shape_cast %42 : vector<1x8x4xf32> to vector<8x4xf32>
    %cst_45 = arith.constant dense<0.000000e+00> : vector<8x1024xf32>
    %44 = tpu.matmul %43, %41, %cst_45 {dimension_numbers = #tpu.dot_dimension_numbers<[1], [0], [0], [1], [0, 0, 1, 1], [], []>} : vector<8x4xf32>, vector<4x1024xf32>, vector<8x1024xf32> -> vector<8x1024xf32>
    %45 = arith.addf %33, %44 : vector<8x1024xf32>
    %46 = vector.extract_strided_slice %32 {offsets = [0, 992], sizes = [4, 32], strides = [1, 1]} : vector<4x1024xf32> to vector<4x32xf32>
    %47 = vector.extract_strided_slice %32 {offsets = [0, 0], sizes = [4, 992], strides = [1, 1]} : vector<4x1024xf32> to vector<4x992xf32>
    %48 = tpu.concatenate %46, %47 in 1 : vector<4x32xf32>, vector<4x992xf32> -> vector<4x1024xf32>
    %c1 = arith.constant 1 : index
    %c0_46 = arith.constant 0 : index
    %49 = vector.load %arg3[%c1, %c0_46] : memref<9x1024xf32, #tpu.memory_space<vmem>>, vector<1x1024xf32>
    %50 = vector.shape_cast %49 : vector<1x1024xf32> to vector<1024xf32>
    %51 = vector.shape_cast %50 : vector<1024xf32> to vector<1x1024xf32>
    %52 = vector.broadcast %51 : vector<1x1024xf32> to vector<4x1024xf32>
    %53 = arith.mulf %48, %52 : vector<4x1024xf32>
    %c1_47 = arith.constant 1 : index
    %c0_48 = arith.constant 0 : index
    %c0_49 = arith.constant 0 : index
    %54 = vector.load %arg4[%c1_47, %c0_48, %c0_49] : memref<9x8x4xf32, #tpu.memory_space<vmem>>, vector<1x8x4xf32>
    %55 = vector.shape_cast %54 : vector<1x8x4xf32> to vector<8x4xf32>
    %cst_50 = arith.constant dense<0.000000e+00> : vector<8x1024xf32>
    %56 = tpu.matmul %55, %53, %cst_50 {dimension_numbers = #tpu.dot_dimension_numbers<[1], [0], [0], [1], [0, 0, 1, 1], [], []>} : vector<8x4xf32>, vector<4x1024xf32>, vector<8x1024xf32> -> vector<8x1024xf32>
    %57 = arith.addf %45, %56 : vector<8x1024xf32>
    %58 = vector.extract_strided_slice %32 {offsets = [0, 993], sizes = [4, 31], strides = [1, 1]} : vector<4x1024xf32> to vector<4x31xf32>
    %59 = vector.extract_strided_slice %32 {offsets = [0, 0], sizes = [4, 993], strides = [1, 1]} : vector<4x1024xf32> to vector<4x993xf32>
    %60 = tpu.concatenate %58, %59 in 1 : vector<4x31xf32>, vector<4x993xf32> -> vector<4x1024xf32>
    %c2 = arith.constant 2 : index
    %c0_51 = arith.constant 0 : index
    %61 = vector.load %arg3[%c2, %c0_51] : memref<9x1024xf32, #tpu.memory_space<vmem>>, vector<1x1024xf32>
    %62 = vector.shape_cast %61 : vector<1x1024xf32> to vector<1024xf32>
    %63 = vector.shape_cast %62 : vector<1024xf32> to vector<1x1024xf32>
    %64 = vector.broadcast %63 : vector<1x1024xf32> to vector<4x1024xf32>
    %65 = arith.mulf %60, %64 : vector<4x1024xf32>
    %c2_52 = arith.constant 2 : index
    %c0_53 = arith.constant 0 : index
    %c0_54 = arith.constant 0 : index
    %66 = vector.load %arg4[%c2_52, %c0_53, %c0_54] : memref<9x8x4xf32, #tpu.memory_space<vmem>>, vector<1x8x4xf32>
    %67 = vector.shape_cast %66 : vector<1x8x4xf32> to vector<8x4xf32>
    %cst_55 = arith.constant dense<0.000000e+00> : vector<8x1024xf32>
    %68 = tpu.matmul %67, %65, %cst_55 {dimension_numbers = #tpu.dot_dimension_numbers<[1], [0], [0], [1], [0, 0, 1, 1], [], []>} : vector<8x4xf32>, vector<4x1024xf32>, vector<8x1024xf32> -> vector<8x1024xf32>
    %69 = arith.addf %57, %68 : vector<8x1024xf32>
    %70 = vector.extract_strided_slice %32 {offsets = [0, 1023], sizes = [4, 1], strides = [1, 1]} : vector<4x1024xf32> to vector<4x1xf32>
    %71 = vector.extract_strided_slice %32 {offsets = [0, 0], sizes = [4, 1023], strides = [1, 1]} : vector<4x1024xf32> to vector<4x1023xf32>
    %72 = tpu.concatenate %70, %71 in 1 : vector<4x1xf32>, vector<4x1023xf32> -> vector<4x1024xf32>
    %c3 = arith.constant 3 : index
    %c0_56 = arith.constant 0 : index
    %73 = vector.load %arg3[%c3, %c0_56] : memref<9x1024xf32, #tpu.memory_space<vmem>>, vector<1x1024xf32>
    %74 = vector.shape_cast %73 : vector<1x1024xf32> to vector<1024xf32>
    %75 = vector.shape_cast %74 : vector<1024xf32> to vector<1x1024xf32>
    %76 = vector.broadcast %75 : vector<1x1024xf32> to vector<4x1024xf32>
    %77 = arith.mulf %72, %76 : vector<4x1024xf32>
    %c3_57 = arith.constant 3 : index
    %c0_58 = arith.constant 0 : index
    %c0_59 = arith.constant 0 : index
    %78 = vector.load %arg4[%c3_57, %c0_58, %c0_59] : memref<9x8x4xf32, #tpu.memory_space<vmem>>, vector<1x8x4xf32>
    %79 = vector.shape_cast %78 : vector<1x8x4xf32> to vector<8x4xf32>
    %cst_60 = arith.constant dense<0.000000e+00> : vector<8x1024xf32>
    %80 = tpu.matmul %79, %77, %cst_60 {dimension_numbers = #tpu.dot_dimension_numbers<[1], [0], [0], [1], [0, 0, 1, 1], [], []>} : vector<8x4xf32>, vector<4x1024xf32>, vector<8x1024xf32> -> vector<8x1024xf32>
    %81 = arith.addf %69, %80 : vector<8x1024xf32>
    %c4 = arith.constant 4 : index
    %c0_61 = arith.constant 0 : index
    %82 = vector.load %arg3[%c4, %c0_61] : memref<9x1024xf32, #tpu.memory_space<vmem>>, vector<1x1024xf32>
    %83 = vector.shape_cast %82 : vector<1x1024xf32> to vector<1024xf32>
    %84 = vector.shape_cast %83 : vector<1024xf32> to vector<1x1024xf32>
    %85 = vector.broadcast %84 : vector<1x1024xf32> to vector<4x1024xf32>
    %86 = arith.mulf %32, %85 : vector<4x1024xf32>
    %c4_62 = arith.constant 4 : index
    %c0_63 = arith.constant 0 : index
    %c0_64 = arith.constant 0 : index
    %87 = vector.load %arg4[%c4_62, %c0_63, %c0_64] : memref<9x8x4xf32, #tpu.memory_space<vmem>>, vector<1x8x4xf32>
    %88 = vector.shape_cast %87 : vector<1x8x4xf32> to vector<8x4xf32>
    %cst_65 = arith.constant dense<0.000000e+00> : vector<8x1024xf32>
    %89 = tpu.matmul %88, %86, %cst_65 {dimension_numbers = #tpu.dot_dimension_numbers<[1], [0], [0], [1], [0, 0, 1, 1], [], []>} : vector<8x4xf32>, vector<4x1024xf32>, vector<8x1024xf32> -> vector<8x1024xf32>
    %90 = arith.addf %81, %89 : vector<8x1024xf32>
    %91 = vector.extract_strided_slice %32 {offsets = [0, 1], sizes = [4, 1023], strides = [1, 1]} : vector<4x1024xf32> to vector<4x1023xf32>
    %92 = vector.extract_strided_slice %32 {offsets = [0, 0], sizes = [4, 1], strides = [1, 1]} : vector<4x1024xf32> to vector<4x1xf32>
    %93 = tpu.concatenate %91, %92 in 1 : vector<4x1023xf32>, vector<4x1xf32> -> vector<4x1024xf32>
    %c5 = arith.constant 5 : index
    %c0_66 = arith.constant 0 : index
    %94 = vector.load %arg3[%c5, %c0_66] : memref<9x1024xf32, #tpu.memory_space<vmem>>, vector<1x1024xf32>
    %95 = vector.shape_cast %94 : vector<1x1024xf32> to vector<1024xf32>
    %96 = vector.shape_cast %95 : vector<1024xf32> to vector<1x1024xf32>
    %97 = vector.broadcast %96 : vector<1x1024xf32> to vector<4x1024xf32>
    %98 = arith.mulf %93, %97 : vector<4x1024xf32>
    %c5_67 = arith.constant 5 : index
    %c0_68 = arith.constant 0 : index
    %c0_69 = arith.constant 0 : index
    %99 = vector.load %arg4[%c5_67, %c0_68, %c0_69] : memref<9x8x4xf32, #tpu.memory_space<vmem>>, vector<1x8x4xf32>
    %100 = vector.shape_cast %99 : vector<1x8x4xf32> to vector<8x4xf32>
    %cst_70 = arith.constant dense<0.000000e+00> : vector<8x1024xf32>
    %101 = tpu.matmul %100, %98, %cst_70 {dimension_numbers = #tpu.dot_dimension_numbers<[1], [0], [0], [1], [0, 0, 1, 1], [], []>} : vector<8x4xf32>, vector<4x1024xf32>, vector<8x1024xf32> -> vector<8x1024xf32>
    %102 = arith.addf %90, %101 : vector<8x1024xf32>
    %103 = vector.extract_strided_slice %32 {offsets = [0, 31], sizes = [4, 993], strides = [1, 1]} : vector<4x1024xf32> to vector<4x993xf32>
    %104 = vector.extract_strided_slice %32 {offsets = [0, 0], sizes = [4, 31], strides = [1, 1]} : vector<4x1024xf32> to vector<4x31xf32>
    %105 = tpu.concatenate %103, %104 in 1 : vector<4x993xf32>, vector<4x31xf32> -> vector<4x1024xf32>
    %c6 = arith.constant 6 : index
    %c0_71 = arith.constant 0 : index
    %106 = vector.load %arg3[%c6, %c0_71] : memref<9x1024xf32, #tpu.memory_space<vmem>>, vector<1x1024xf32>
    %107 = vector.shape_cast %106 : vector<1x1024xf32> to vector<1024xf32>
    %108 = vector.shape_cast %107 : vector<1024xf32> to vector<1x1024xf32>
    %109 = vector.broadcast %108 : vector<1x1024xf32> to vector<4x1024xf32>
    %110 = arith.mulf %105, %109 : vector<4x1024xf32>
    %c6_72 = arith.constant 6 : index
    %c0_73 = arith.constant 0 : index
    %c0_74 = arith.constant 0 : index
    %111 = vector.load %arg4[%c6_72, %c0_73, %c0_74] : memref<9x8x4xf32, #tpu.memory_space<vmem>>, vector<1x8x4xf32>
    %112 = vector.shape_cast %111 : vector<1x8x4xf32> to vector<8x4xf32>
    %cst_75 = arith.constant dense<0.000000e+00> : vector<8x1024xf32>
    %113 = tpu.matmul %112, %110, %cst_75 {dimension_numbers = #tpu.dot_dimension_numbers<[1], [0], [0], [1], [0, 0, 1, 1], [], []>} : vector<8x4xf32>, vector<4x1024xf32>, vector<8x1024xf32> -> vector<8x1024xf32>
    %114 = arith.addf %102, %113 : vector<8x1024xf32>
    %115 = vector.extract_strided_slice %32 {offsets = [0, 32], sizes = [4, 992], strides = [1, 1]} : vector<4x1024xf32> to vector<4x992xf32>
    %116 = vector.extract_strided_slice %32 {offsets = [0, 0], sizes = [4, 32], strides = [1, 1]} : vector<4x1024xf32> to vector<4x32xf32>
    %117 = tpu.concatenate %115, %116 in 1 : vector<4x992xf32>, vector<4x32xf32> -> vector<4x1024xf32>
    %c7 = arith.constant 7 : index
    %c0_76 = arith.constant 0 : index
    %118 = vector.load %arg3[%c7, %c0_76] : memref<9x1024xf32, #tpu.memory_space<vmem>>, vector<1x1024xf32>
    %119 = vector.shape_cast %118 : vector<1x1024xf32> to vector<1024xf32>
    %120 = vector.shape_cast %119 : vector<1024xf32> to vector<1x1024xf32>
    %121 = vector.broadcast %120 : vector<1x1024xf32> to vector<4x1024xf32>
    %122 = arith.mulf %117, %121 : vector<4x1024xf32>
    %c7_77 = arith.constant 7 : index
    %c0_78 = arith.constant 0 : index
    %c0_79 = arith.constant 0 : index
    %123 = vector.load %arg4[%c7_77, %c0_78, %c0_79] : memref<9x8x4xf32, #tpu.memory_space<vmem>>, vector<1x8x4xf32>
    %124 = vector.shape_cast %123 : vector<1x8x4xf32> to vector<8x4xf32>
    %cst_80 = arith.constant dense<0.000000e+00> : vector<8x1024xf32>
    %125 = tpu.matmul %124, %122, %cst_80 {dimension_numbers = #tpu.dot_dimension_numbers<[1], [0], [0], [1], [0, 0, 1, 1], [], []>} : vector<8x4xf32>, vector<4x1024xf32>, vector<8x1024xf32> -> vector<8x1024xf32>
    %126 = arith.addf %114, %125 : vector<8x1024xf32>
    %127 = vector.extract_strided_slice %32 {offsets = [0, 33], sizes = [4, 991], strides = [1, 1]} : vector<4x1024xf32> to vector<4x991xf32>
    %128 = vector.extract_strided_slice %32 {offsets = [0, 0], sizes = [4, 33], strides = [1, 1]} : vector<4x1024xf32> to vector<4x33xf32>
    %129 = tpu.concatenate %127, %128 in 1 : vector<4x991xf32>, vector<4x33xf32> -> vector<4x1024xf32>
    %c8 = arith.constant 8 : index
    %c0_81 = arith.constant 0 : index
    %130 = vector.load %arg3[%c8, %c0_81] : memref<9x1024xf32, #tpu.memory_space<vmem>>, vector<1x1024xf32>
    %131 = vector.shape_cast %130 : vector<1x1024xf32> to vector<1024xf32>
    %132 = vector.shape_cast %131 : vector<1024xf32> to vector<1x1024xf32>
    %133 = vector.broadcast %132 : vector<1x1024xf32> to vector<4x1024xf32>
    %134 = arith.mulf %129, %133 : vector<4x1024xf32>
    %c8_82 = arith.constant 8 : index
    %c0_83 = arith.constant 0 : index
    %c0_84 = arith.constant 0 : index
    %135 = vector.load %arg4[%c8_82, %c0_83, %c0_84] : memref<9x8x4xf32, #tpu.memory_space<vmem>>, vector<1x8x4xf32>
    %136 = vector.shape_cast %135 : vector<1x8x4xf32> to vector<8x4xf32>
    %cst_85 = arith.constant dense<0.000000e+00> : vector<8x1024xf32>
    %137 = tpu.matmul %136, %134, %cst_85 {dimension_numbers = #tpu.dot_dimension_numbers<[1], [0], [0], [1], [0, 0, 1, 1], [], []>} : vector<8x4xf32>, vector<4x1024xf32>, vector<8x1024xf32> -> vector<8x1024xf32>
    %138 = arith.addf %126, %137 : vector<8x1024xf32>
    %c0_86 = arith.constant 0 : index
    %c0_87 = arith.constant 0 : index
    %139 = vector.load %arg5[%c0_86, %c0_87] : memref<8x1xf32, #tpu.memory_space<vmem>>, vector<8x1xf32>
    %140 = vector.broadcast %139 : vector<8x1xf32> to vector<8x1024xf32>
    %141 = arith.addf %138, %140 : vector<8x1024xf32>
    %c0_88 = arith.constant 0 : index
    %c0_89 = arith.constant 0 : index
    %c0_90 = arith.constant 0 : index
    %142 = vector.load %arg6[%c0_88, %c0_89, %c0_90] : memref<1x8x1024xf32, #tpu.memory_space<vmem>>, vector<1x8x1024xf32>
    %143 = vector.shape_cast %142 : vector<1x8x1024xf32> to vector<8x1024xf32>
    %144 = vector.shape_cast %141 : vector<8x1024xf32> to vector<1x8x1024xf32>
    tpu.vector_store %arg6[%c0_88, %c0_89, %c0_90], %144 {strides = array<i32>} : memref<1x8x1024xf32, #tpu.memory_space<vmem>>, vector<1x8x1024xf32>,
    %cst_91 = arith.constant dense<0.000000e+00> : vector<8xf32>
    %145 = vector.multi_reduction <add>, %141, %cst_91 [1] : vector<8x1024xf32> to vector<8xf32>
    %c0_92 = arith.constant 0 : index
    %c0_93 = arith.constant 0 : index
    %c0_94 = arith.constant 0 : index
    %146 = vector.load %arg7[%c0_92, %c0_93, %c0_94] : memref<1x2x8xf32, #tpu.memory_space<vmem>>, vector<1x1x8xf32>
    %147 = vector.shape_cast %146 : vector<1x1x8xf32> to vector<8xf32>
    %148 = vector.shape_cast %145 : vector<8xf32> to vector<1x1x8xf32>
    tpu.vector_store %arg7[%c0_92, %c0_93, %c0_94], %148 {strides = array<i32>} : memref<1x2x8xf32, #tpu.memory_space<vmem>>, vector<1x1x8xf32>,
    %149 = arith.mulf %141, %141 : vector<8x1024xf32>
    %cst_95 = arith.constant dense<0.000000e+00> : vector<8xf32>
    %150 = vector.multi_reduction <add>, %149, %cst_95 [1] : vector<8x1024xf32> to vector<8xf32>
    %c0_96 = arith.constant 0 : index
    %c1_97 = arith.constant 1 : index
    %c0_98 = arith.constant 0 : index
    %151 = vector.load %arg7[%c0_96, %c1_97, %c0_98] : memref<1x2x8xf32, #tpu.memory_space<vmem>>, vector<1x1x8xf32>
    %152 = vector.shape_cast %151 : vector<1x1x8xf32> to vector<8xf32>
    %153 = vector.shape_cast %150 : vector<8xf32> to vector<1x1x8xf32>
    tpu.vector_store %arg7[%c0_96, %c1_97, %c0_98], %153 {strides = array<i32>} : memref<1x2x8xf32, #tpu.memory_space<vmem>>, vector<1x1x8xf32>,
    return
  }
  func.func @transform_0(%arg0: i32) -> (i32, i32, i32) {
    %c0_i32 = arith.constant 0 : i32
    %c0_i32_0 = arith.constant 0 : i32
    %c0_i32_1 = arith.constant 0 : i32
    return %arg0, %c0_i32, %c0_i32_0 : i32, i32, i32
  }
  func.func @transform_1(%arg0: i32) -> (i32, i32) {
    %c0_i32 = arith.constant 0 : i32
    %c0_i32_0 = arith.constant 0 : i32
    %c0_i32_1 = arith.constant 0 : i32
    return %c0_i32, %c0_i32_0 : i32, i32
  }
  func.func @transform_2(%arg0: i32) -> (i32, i32) {
    %c0_i32 = arith.constant 0 : i32
    %c0_i32_0 = arith.constant 0 : i32
    %c0_i32_1 = arith.constant 0 : i32
    return %c0_i32, %c0_i32_0 : i32, i32
  }
  func.func @transform_3(%arg0: i32) -> (i32, i32, i32) {
    %c0_i32 = arith.constant 0 : i32
    %c0_i32_0 = arith.constant 0 : i32
    %c0_i32_1 = arith.constant 0 : i32
    %c0_i32_2 = arith.constant 0 : i32
    return %c0_i32, %c0_i32_0, %c0_i32_1 : i32, i32, i32
  }
  func.func @transform_4(%arg0: i32) -> (i32, i32) {
    %c0_i32 = arith.constant 0 : i32
    %c0_i32_0 = arith.constant 0 : i32
    %c0_i32_1 = arith.constant 0 : i32
    return %c0_i32, %c0_i32_0 : i32, i32
  }
  func.func @transform_5(%arg0: i32) -> (i32, i32, i32) {
    %c0_i32 = arith.constant 0 : i32
    %c0_i32_0 = arith.constant 0 : i32
    %c0_i32_1 = arith.constant 0 : i32
    return %arg0, %c0_i32, %c0_i32_0 : i32, i32, i32
  }
  func.func @transform_6(%arg0: i32) -> (i32, i32, i32) {
    %c0_i32 = arith.constant 0 : i32
    %c0_i32_0 = arith.constant 0 : i32
    %c0_i32_1 = arith.constant 0 : i32
    return %arg0, %c0_i32, %c0_i32_0 : i32, i32, i32
  }
}

module attributes {stable_mosaic.version = 11 : i64} {
  func.func @bn_relu_kernel(%arg0: i32, %arg1: memref<2x8x1024xf32, #tpu.memory_space<vmem>>, %arg2: memref<1x8x1xf32, #tpu.memory_space<vmem>>, %arg3: memref<1x8x1xf32, #tpu.memory_space<vmem>>, %arg4: memref<2x8x1024xf32, #tpu.memory_space<vmem>>) attributes {dimension_semantics = [#tpu.dimension_semantics<arbitrary>], iteration_bounds = array<i64: 1>, scalar_prefetch = 0 : i64, scratch_operands = 0 : i64, tpu.core_type = #tpu.core_type<tc>, window_params = [{pipeline_mode = #tpu.pipeline_mode<synchronous>, transform_indices = @transform_0, window_bounds = array<i64: 2, 8, 1024>}, {pipeline_mode = #tpu.pipeline_mode<synchronous>, transform_indices = @transform_1, window_bounds = array<i64: 1, 8, 1>}, {pipeline_mode = #tpu.pipeline_mode<synchronous>, transform_indices = @transform_2, window_bounds = array<i64: 1, 8, 1>}, {pipeline_mode = #tpu.pipeline_mode<synchronous>, transform_indices = @transform_3, window_bounds = array<i64: 2, 8, 1024>}]} {
    %c0 = arith.constant 0 : index
    %c0_0 = arith.constant 0 : index
    %c0_1 = arith.constant 0 : index
    %0 = vector.load %arg1[%c0, %c0_0, %c0_1] : memref<2x8x1024xf32, #tpu.memory_space<vmem>>, vector<2x8x1024xf32>
    %c0_2 = arith.constant 0 : index
    %c0_3 = arith.constant 0 : index
    %c0_4 = arith.constant 0 : index
    %1 = vector.load %arg2[%c0_2, %c0_3, %c0_4] : memref<1x8x1xf32, #tpu.memory_space<vmem>>, vector<1x8x1xf32>
    %2 = vector.broadcast %1 : vector<1x8x1xf32> to vector<2x8x1024xf32>
    %3 = arith.mulf %0, %2 : vector<2x8x1024xf32>
    %c0_5 = arith.constant 0 : index
    %c0_6 = arith.constant 0 : index
    %c0_7 = arith.constant 0 : index
    %4 = vector.load %arg3[%c0_5, %c0_6, %c0_7] : memref<1x8x1xf32, #tpu.memory_space<vmem>>, vector<1x8x1xf32>
    %5 = vector.broadcast %4 : vector<1x8x1xf32> to vector<2x8x1024xf32>
    %6 = arith.addf %3, %5 : vector<2x8x1024xf32>
    %cst = arith.constant 0.000000e+00 : f32
    %7 = vector.broadcast %cst : f32 to vector<2x8x1024xf32>
    %8 = arith.maximumf %6, %7 : vector<2x8x1024xf32>
    %c0_8 = arith.constant 0 : index
    %c0_9 = arith.constant 0 : index
    %c0_10 = arith.constant 0 : index
    %9 = vector.load %arg4[%c0_8, %c0_9, %c0_10] : memref<2x8x1024xf32, #tpu.memory_space<vmem>>, vector<2x8x1024xf32>
    tpu.vector_store %arg4[%c0_8, %c0_9, %c0_10], %8 {strides = array<i32>} : memref<2x8x1024xf32, #tpu.memory_space<vmem>>, vector<2x8x1024xf32>,
    return
  }
  func.func @transform_0(%arg0: i32) -> (i32, i32, i32) {
    %c0_i32 = arith.constant 0 : i32
    %c0_i32_0 = arith.constant 0 : i32
    %c0_i32_1 = arith.constant 0 : i32
    %c0_i32_2 = arith.constant 0 : i32
    return %c0_i32, %c0_i32_0, %c0_i32_1 : i32, i32, i32
  }
  func.func @transform_1(%arg0: i32) -> (i32, i32, i32) {
    %c0_i32 = arith.constant 0 : i32
    %c0_i32_0 = arith.constant 0 : i32
    %c0_i32_1 = arith.constant 0 : i32
    %c0_i32_2 = arith.constant 0 : i32
    return %c0_i32, %c0_i32_0, %c0_i32_1 : i32, i32, i32
  }
  func.func @transform_2(%arg0: i32) -> (i32, i32, i32) {
    %c0_i32 = arith.constant 0 : i32
    %c0_i32_0 = arith.constant 0 : i32
    %c0_i32_1 = arith.constant 0 : i32
    %c0_i32_2 = arith.constant 0 : i32
    return %c0_i32, %c0_i32_0, %c0_i32_1 : i32, i32, i32
  }
  func.func @transform_3(%arg0: i32) -> (i32, i32, i32) {
    %c0_i32 = arith.constant 0 : i32
    %c0_i32_0 = arith.constant 0 : i32
    %c0_i32_1 = arith.constant 0 : i32
    %c0_i32_2 = arith.constant 0 : i32
    return %c0_i32, %c0_i32_0, %c0_i32_1 : i32, i32, i32
  }
}

</mosaic_0001>

<bundles_post_ra>
// kernel: up_conv_forward.3
= control target key start
LH: loop header
LB: loop body
LE: loop exit
PB: predicated region body
PF: predicated region fallthrough
CT: control target
= control target key end

     0   :  { %v112_v0 = vmov 0   ;;  %s235_s1 = inlined_call_operand.vmem [shape: f32[1,8,1], index: 1, kind: input, shape index: {}]   ;;  %s236_s2 = inlined_call_operand.vmem [shape: f32[1,8,1], index: 2, kind: input, shape index: {}]   ;;  %s237_s0 = inlined_call_operand.vmem [shape: f32[2,8,1024], index: 0, kind: input, shape index: {}, may-alias: {0,3}]   ;;  %s238_s3 = inlined_call_operand.vmem [shape: f32[2,8,1024], index: 3, kind: output, shape index: {}, may-alias: {0,3}]  }
   0x1   :  { %111 = vset.pattern.permute.xlu0 %v112_v0  ;;  %v30_v1 = vld [vmem:[%s235_s1] sm:$0xff]  ;;  %v15_v4 = vld [vmem:[%s237_s0 + $0x8] sm:$0xff]  ;;  %v16_v5 = vld [vmem:[%s237_s0 + $0x10] sm:$0xff] }
   0x2   :  { %33 = vperm.xlu0 %111, %v30_v1   ;;  %v52_v2 = vld [vmem:[%s236_s2] sm:$0xff]  ;;  %v17_v6 = vld [vmem:[%s237_s0 + $0x18] sm:$0xff]  ;;  %v19_v8 = vld [vmem:[%s237_s0 + $0x28] sm:$0xff] }
   0x3   :  { %v14_v3 = vld [vmem:[%s237_s0] sm:$0xff]  ;;  %v20_v9 = vld [vmem:[%s237_s0 + $0x30] sm:$0xff]  ;;  %v21_v10 = vld [vmem:[%s237_s0 + $0x38] sm:$0xff] }
   0x4   :  { %v18_v7 = vld [vmem:[%s237_s0 + $0x20] sm:$0xff]  ;;  %v23_v12 = vld [vmem:[%s237_s0 + $0x48] sm:$0xff]  ;;  %v24_v14 = vld [vmem:[%s237_s0 + $0x50] sm:$0xff] }
   0x5   :  { %v22_v11 = vld [vmem:[%s237_s0 + $0x40] sm:$0xff]  ;;  %v25_v15 = vld [vmem:[%s237_s0 + $0x58] sm:$0xff]  ;;  %v27_v17 = vld [vmem:[%s237_s0 + $0x68] sm:$0xff] }
   0x6   :  { %55 = vperm.xlu0 %111, %v52_v2   ;;  %v26_v16 = vld [vmem:[%s237_s0 + $0x60] sm:$0xff]  ;;  %v28_v18 = vld [vmem:[%s237_s0 + $0x70] sm:$0xff]  ;;  %v29_v19 = vld [vmem:[%s237_s0 + $0x78] sm:$0xff] }
  0x81   :  { %v34_v13 = vpop.permute.xlu0 %33 }
  0x82   :  { %v36_v20 = vmul.f32 %v34_v13, %v14_v3  ;;  %v37_v21 = vmul.f32 %v34_v13, %v15_v4  ;;  %v38_v22 = vmul.f32 %v34_v13, %v16_v5  ;;  %v39_v23 = vmul.f32 %v34_v13, %v17_v6 }
  0x83   :  { %v40_v24 = vmul.f32 %v34_v13, %v18_v7  ;;  %v41_v25 = vmul.f32 %v34_v13, %v19_v8  ;;  %v42_v26 = vmul.f32 %v34_v13, %v20_v9  ;;  %v43_v27 = vmul.f32 %v34_v13, %v21_v10 }
  0x84   :  { %v44_v28 = vmul.f32 %v34_v13, %v22_v11  ;;  %v45_v29 = vmul.f32 %v34_v13, %v23_v12  ;;  %v46_v30 = vmul.f32 %v34_v13, %v24_v14  ;;  %v47_v31 = vmul.f32 %v34_v13, %v25_v15 }
  0x85   :  { %v56_v32 = vpop.permute.xlu0 %55  ;;  %v48_v33 = vmul.f32 %v34_v13, %v26_v16  ;;  %v49_v34 = vmul.f32 %v34_v13, %v27_v17  ;;  %v50_v35 = vmul.f32 %v34_v13, %v28_v18  ;;  %v51_v36 = vmul.f32 %v34_v13, %v29_v19 }
  0x86   :  { %v58_v37 = vadd.f32 %v56_v32, %v36_v20  ;;  %v59_v38 = vadd.f32 %v56_v32, %v37_v21  ;;  %v60_v39 = vadd.f32 %v56_v32, %v38_v22  ;;  %v61_v40 = vadd.f32 %v56_v32, %v39_v23 }
  0x87   :  { %v62_v41 = vadd.f32 %v56_v32, %v40_v24  ;;  %v63_v42 = vadd.f32 %v56_v32, %v41_v25  ;;  %v64_v43 = vadd.f32 %v56_v32, %v42_v26  ;;  %v65_v44 = vadd.f32 %v56_v32, %v43_v27 }
  0x88   :  { %v66_v45 = vadd.f32 %v56_v32, %v44_v28  ;;  %v67_v46 = vadd.f32 %v56_v32, %v45_v29  ;;  %v68_v47 = vadd.f32 %v56_v32, %v46_v30  ;;  %v69_v48 = vadd.f32 %v56_v32, %v47_v31 }
  0x89   :  { %v70_v49 = vadd.f32 %v56_v32, %v48_v33  ;;  %v71_v50 = vadd.f32 %v56_v32, %v49_v34  ;;  %v72_v51 = vadd.f32 %v56_v32, %v50_v35  ;;  %v73_v52 = vadd.f32 %v56_v32, %v51_v36 }
  0x8a   :  { %v74_v53 = vmax.f32 %v58_v37, 0.0  ;;  %v75_v54 = vmax.f32 %v59_v38, 0.0  ;;  %v76_v55 = vmax.f32 %v60_v39, 0.0  ;;  %v77_v56 = vmax.f32 %v61_v40, 0.0 }
  0x8b   :  { %v78_v57 = vmax.f32 %v62_v41, 0.0  ;;  %v79_v58 = vmax.f32 %v63_v42, 0.0  ;;  %v80_v59 = vmax.f32 %v64_v43, 0.0  ;;  %v81_v60 = vmax.f32 %v65_v44, 0.0 }
  0x8c   :  { %v82_v61 = vmax.f32 %v66_v45, 0.0  ;;  %v83_v62 = vmax.f32 %v67_v46, 0.0  ;;  %v84_v63 = vmax.f32 %v68_v47, 0.0  ;;  %v85_v0 = vmax.f32 %v69_v48, 0.0  ;;  %90 = vst [vmem:[%s238_s3] sm:$0xff] %v74_v53  ;;  %91 = vst [vmem:[%s238_s3 + $0x8] sm:$0xff] %v75_v54 }
  0x8d   :  { %92 = vst [vmem:[%s238_s3 + $0x10] sm:$0xff] %v76_v55  ;;  %93 = vst [vmem:[%s238_s3 + $0x18] sm:$0xff] %v77_v56  ;;  %v86_v1 = vmax.f32 %v70_v49, 0.0  ;;  %v87_v2 = vmax.f32 %v71_v50, 0.0  ;;  %v88_v3 = vmax.f32 %v72_v51, 0.0  ;;  %v89_v4 = vmax.f32 %v73_v52, 0.0 }
  0x8e   :  { %94 = vst [vmem:[%s238_s3 + $0x20] sm:$0xff] %v78_v57  ;;  %95 = vst [vmem:[%s238_s3 + $0x28] sm:$0xff] %v79_v58 }
  0x8f   :  { %96 = vst [vmem:[%s238_s3 + $0x30] sm:$0xff] %v80_v59  ;;  %97 = vst [vmem:[%s238_s3 + $0x38] sm:$0xff] %v81_v60 }
  0x90   :  { %98 = vst [vmem:[%s238_s3 + $0x40] sm:$0xff] %v82_v61  ;;  %99 = vst [vmem:[%s238_s3 + $0x48] sm:$0xff] %v83_v62 }
  0x91   :  { %100 = vst [vmem:[%s238_s3 + $0x50] sm:$0xff] %v84_v63  ;;  %101 = vst [vmem:[%s238_s3 + $0x58] sm:$0xff] %v85_v0 }
  0x92   :  { %102 = vst [vmem:[%s238_s3 + $0x60] sm:$0xff] %v86_v1  ;;  %103 = vst [vmem:[%s238_s3 + $0x68] sm:$0xff] %v87_v2 }
  0x93   :  { %104 = vst [vmem:[%s238_s3 + $0x70] sm:$0xff] %v88_v3  ;;  %105 = vst [vmem:[%s238_s3 + $0x78] sm:$0xff] %v89_v4 }

// kernel: up_conv_forward.2
= control target key start
LH: loop header
LB: loop body
LE: loop exit
PB: predicated region body
PF: predicated region fallthrough
CT: control target
= control target key end

     0   :  { %s5683_s21 = smov 0   ;;  %s7367_s0 = inlined_call_operand.vmem [shape: f32[2,4,256], index: 0, kind: input, shape index: {}]   ;;  %s7368_s1 = inlined_call_operand.vmem [shape: f32[256,1024], index: 1, kind: input, shape index: {}]   ;;  %s7369_s2 = inlined_call_operand.vmem [shape: f32[9,1024], index: 2, kind: input, shape index: {}]   ;;  %s7370_s3 = inlined_call_operand.vmem [shape: f32[9,8,4], index: 3, kind: input, shape index: {}]   ;;  %s7371_s4 = inlined_call_operand.vmem [shape: f32[8,1], index: 4, kind: input, shape index: {}]   ;;  %s7372_s5 = inlined_call_operand.vmem [shape: f32[2,8,1024], index: 5, kind: output, shape index: {0}]   ;;  %s7373_s6 = inlined_call_operand.vmem [shape: f32[2,2,8], index: 6, kind: output, shape index: {1}]  }
   0x1 LB: > { %s4864_s22 = sadd.s32 4294967295, %s5636_s21   ;;  %p4868_p0 = scmp.ge.s32.totalorder %s5636_s21, 1  ;;  %s5636_s21 = sphi %s5683_s21, %s17_s21  }
   0x2   : > { %p215_p1 = scmp.lt.s32.totalorder %s5636_s21, 3 }
   0x4   : > { %p216_p2 = pnand %p4868_p0, %p215_p1 }
   0x6   : > { %219 = sbr.rel (%p216_p2) target bundleno = 922 (0x39a), region = 40 }
   0xd   : > { %v280_v0 = vld [vmem:[%s7368_s1 + $0x400] sm:$0xff]  ;;  %v385_v2 = vld [vmem:[%s7368_s1 + $0x408] sm:$0xff]  ;;  %p5765_p3 = scmp.lt.s32.totalorder %s4864_s22, 1  ;;  %s5638_s11 = smov 32   ;;  %vm1195_vm0 = vcmask 261120   ;;  %vm1271_vm1 = vcmask 1043456  }
   0xe   : > { %v281_v1 = vld [vmem:[%s7368_s1 + $0x440] sm:$0xff]  ;;  %v386_v4 = vld [vmem:[%s7368_s1 + $0x448] sm:$0xff]  ;;  %s5639_s12 = smov 33   ;;  %s5640_s27 = smov 31   ;;  %vm1267_vm2 = vcmask 31744   ;;  %vm1108_vm3 = vcmask 269312  }
   0xf   : > { %v5290_v3 = vpack.c.bf16 %v281_v1, %v280_v0  ;;  %v264_v5 = vld [vmem:[%s7368_s1] sm:$0xff]  ;;  %v5322_v7 = vpack.c.bf16 %v386_v4, %v385_v2  ;;  %v369_v9 = vld [vmem:[%s7368_s1 + $0x8] sm:$0xff]  ;;  %s7387_s22 = smov (!%p5765_p3, %s4864_s22), 1  ;;  %s5641_s13 = smov 1   ;;  %vm1908_vm4 = vcmask 252928   ;;  %vm2316_vm5 = vcmask 7168  }
  0x10   : > { %v265_v6 = vld [vmem:[%s7368_s1 + $0x40] sm:$0xff]  ;;  %v370_v10 = vld [vmem:[%s7368_s1 + $0x48] sm:$0xff]  ;;  %s5008_s24 = sshll.u32 %s7387_s22, 3  ;;  %s5642_s14 = smov 127   ;;  %vm3097_vm6 = vcmask 1039360   ;;  %vm3505_vm7 = vcmask 793600  }
  0x11   : > { %v5292_v8 = vpack.c.bf16 %v265_v6, %v264_v5  ;;  %v282_v11 = vld [vmem:[%s7368_s1 + $0x480] sm:$0xff]  ;;  %5291 = vmatprep.subr.bf16.mxu0 %v5290_v3  ;;  %v5324_v12 = vpack.c.bf16 %v370_v10, %v369_v9  ;;  %v387_v14 = vld [vmem:[%s7368_s1 + $0x488] sm:$0xff]  ;;  %5323 = vmatprep.subr.bf16.mxu1 %v5322_v7  ;;  %s253_s15 = scalar_lea.vmem %s7367_s0, %s5008_s24  ;;  %s5645_s20 = smov 96   ;;  %vm3913_vm8 = vcmask 785408   ;;  %vm4321_vm9 = vcmask 777216  }
  0x12   : > { %v283_v13 = vld [vmem:[%s7368_s1 + $0x4c0] sm:$0xff]  ;;  %v388_v15 = vld [vmem:[%s7368_s1 + $0x4c8] sm:$0xff]  ;;  %s5646_s23 = smov 95   ;;  %s5009_s9 = sshll.u32 %s7387_s22, 6  ;;  %vm4752_vm10 = vcmask 57344  }
  0x13   : > { %5293 = vmatpush3.bf16.msra.mxu0 %v5292_v8  ;;  %v5294_v16 = vpack.c.bf16 %v283_v13, %v282_v11  ;;  %v5326_v17 = vpack.c.bf16 %v388_v15, %v387_v14  ;;  %v266_v18 = vld [vmem:[%s7368_s1 + $0x80] sm:$0xff]  ;;  %v371_v20 = vld [vmem:[%s7368_s1 + $0x88] sm:$0xff]  ;;  %5325 = vmatpush3.bf16.msra.mxu1 %v5324_v12 }
  0x14   : > { %v267_v19 = vld [vmem:[%s7368_s1 + $0xc0] sm:$0xff]  ;;  %v372_v22 = vld [vmem:[%s7368_s1 + $0xc8] sm:$0xff] }
  0x15   : > { %v5296_v21 = vpack.c.bf16 %v267_v19, %v266_v18  ;;  %v284_v23 = vld [vmem:[%s7368_s1 + $0x500] sm:$0xff]  ;;  %5295 = vmatprep.subr.bf16.mxu0 %v5294_v16  ;;  %5327 = vmatprep.subr.bf16.mxu1 %v5326_v17  ;;  %v5328_v25 = vpack.c.bf16 %v372_v22, %v371_v20  ;;  %v389_v27 = vld [vmem:[%s7368_s1 + $0x508] sm:$0xff] }
  0x16   : > { %v285_v24 = vld [vmem:[%s7368_s1 + $0x540] sm:$0xff]  ;;  %v390_v28 = vld [vmem:[%s7368_s1 + $0x548] sm:$0xff] }
  0x17   : > { %v5298_v26 = vpack.c.bf16 %v285_v24, %v284_v23  ;;  %v268_v29 = vld [vmem:[%s7368_s1 + $0x100] sm:$0xff]  ;;  %v5330_v30 = vpack.c.bf16 %v390_v28, %v389_v27  ;;  %v373_v32 = vld [vmem:[%s7368_s1 + $0x108] sm:$0xff]  ;;  %5297 = vmatpush3.bf16.msra.mxu0 %v5296_v21  ;;  %5329 = vmatpush3.bf16.msra.mxu1 %v5328_v25 }
  0x18   : > { %v269_v31 = vld [vmem:[%s7368_s1 + $0x140] sm:$0xff]  ;;  %v374_v33 = vld [vmem:[%s7368_s1 + $0x148] sm:$0xff] }
  0x19   : > { %v5300_v34 = vpack.c.bf16 %v269_v31, %v268_v29  ;;  %v286_v35 = vld [vmem:[%s7368_s1 + $0x580] sm:$0xff]  ;;  %v391_v37 = vld [vmem:[%s7368_s1 + $0x588] sm:$0xff]  ;;  %5299 = vmatprep.subr.bf16.mxu0 %v5298_v26  ;;  %v5332_v38 = vpack.c.bf16 %v374_v33, %v373_v32  ;;  %5331 = vmatprep.subr.bf16.mxu1 %v5330_v30  ;;  %v487_v32 = vld [vmem:[%s7368_s1 + $0x410] sm:$0xff] }
  0x1a   : > { %v287_v36 = vld [vmem:[%s7368_s1 + $0x5c0] sm:$0xff]  ;;  %v392_v40 = vld [vmem:[%s7368_s1 + $0x5c8] sm:$0xff]  ;;  %v488_v33 = vld [vmem:[%s7368_s1 + $0x450] sm:$0xff] }
  0x1b   : > { %v5302_v39 = vpack.c.bf16 %v287_v36, %v286_v35  ;;  %v270_v41 = vld [vmem:[%s7368_s1 + $0x180] sm:$0xff]  ;;  %v5334_v43 = vpack.c.bf16 %v392_v40, %v391_v37  ;;  %v375_v44 = vld [vmem:[%s7368_s1 + $0x188] sm:$0xff]  ;;  %5301 = vmatpush3.bf16.msra.mxu0 %v5300_v34  ;;  %5333 = vmatpush3.bf16.msra.mxu1 %v5332_v38  ;;  %v589_v34 = vld [vmem:[%s7368_s1 + $0x418] sm:$0xff]  ;;  %v5354_v38 = vpack.c.bf16 %v488_v33, %v487_v32 }
  0x1c   : > { %v271_v42 = vld [vmem:[%s7368_s1 + $0x1c0] sm:$0xff]  ;;  %v376_v45 = vld [vmem:[%s7368_s1 + $0x1c8] sm:$0xff]  ;;  %v590_v35 = vld [vmem:[%s7368_s1 + $0x458] sm:$0xff] }
  0x1d   : > { %v288_v46 = vld [vmem:[%s7368_s1 + $0x600] sm:$0xff]  ;;  %v393_v48 = vld [vmem:[%s7368_s1 + $0x608] sm:$0xff]  ;;  %v5304_v50 = vpack.c.bf16 %v271_v42, %v270_v41  ;;  %5303 = vmatprep.subr.bf16.mxu0 %v5302_v39  ;;  %v5336_v51 = vpack.c.bf16 %v376_v45, %v375_v44  ;;  %5335 = vmatprep.subr.bf16.mxu1 %v5334_v43  ;;  %v471_v39 = vld [vmem:[%s7368_s1 + $0x10] sm:$0xff]  ;;  %v5386_v42 = vpack.c.bf16 %v590_v35, %v589_v34 }
  0x1e   : > { %v289_v47 = vld [vmem:[%s7368_s1 + $0x640] sm:$0xff]  ;;  %v394_v49 = vld [vmem:[%s7368_s1 + $0x648] sm:$0xff]  ;;  %v472_v40 = vld [vmem:[%s7368_s1 + $0x50] sm:$0xff] }
  0x1f   : > { %v5306_v52 = vpack.c.bf16 %v289_v47, %v288_v46  ;;  %v272_v53 = vld [vmem:[%s7368_s1 + $0x200] sm:$0xff]  ;;  %v377_v55 = vld [vmem:[%s7368_s1 + $0x208] sm:$0xff]  ;;  %v5338_v56 = vpack.c.bf16 %v394_v49, %v393_v48  ;;  %5305 = vmatpush3.bf16.msra.mxu0 %v5304_v50  ;;  %5337 = vmatpush3.bf16.msra.mxu1 %v5336_v51  ;;  %v573_v41 = vld [vmem:[%s7368_s1 + $0x18] sm:$0xff]  ;;  %v5356_v48 = vpack.c.bf16 %v472_v40, %v471_v39 }
  0x20   : > { %v273_v54 = vld [vmem:[%s7368_s1 + $0x240] sm:$0xff]  ;;  %v378_v57 = vld [vmem:[%s7368_s1 + $0x248] sm:$0xff]  ;;  %v574_v43 = vld [vmem:[%s7368_s1 + $0x58] sm:$0xff] }
  0x21   : > { %v290_v58 = vld [vmem:[%s7368_s1 + $0x680] sm:$0xff]  ;;  %v395_v60 = vld [vmem:[%s7368_s1 + $0x688] sm:$0xff]  ;;  %v5308_v62 = vpack.c.bf16 %v273_v54, %v272_v53  ;;  %5307 = vmatprep.subr.bf16.mxu0 %v5306_v52  ;;  %v5340_v63 = vpack.c.bf16 %v378_v57, %v377_v55  ;;  %5339 = vmatprep.subr.bf16.mxu1 %v5338_v56  ;;  %v489_v44 = vld [vmem:[%s7368_s1 + $0x490] sm:$0xff]  ;;  %v5388_v49 = vpack.c.bf16 %v574_v43, %v573_v41 }
  0x22   : > { %v291_v59 = vld [vmem:[%s7368_s1 + $0x6c0] sm:$0xff]  ;;  %v396_v61 = vld [vmem:[%s7368_s1 + $0x6c8] sm:$0xff]  ;;  %v490_v45 = vld [vmem:[%s7368_s1 + $0x4d0] sm:$0xff] }
  0x23   : > { %v5310_v0 = vpack.c.bf16 %v291_v59, %v290_v58  ;;  %v274_v1 = vld [vmem:[%s7368_s1 + $0x280] sm:$0xff]  ;;  %v379_v3 = vld [vmem:[%s7368_s1 + $0x288] sm:$0xff]  ;;  %v5342_v4 = vpack.c.bf16 %v396_v61, %v395_v60  ;;  %5309 = vmatpush3.bf16.msra.mxu0 %v5308_v62  ;;  %5341 = vmatpush3.bf16.msra.mxu1 %v5340_v63  ;;  %v591_v46 = vld [vmem:[%s7368_s1 + $0x498] sm:$0xff]  ;;  %v5358_v50 = vpack.c.bf16 %v490_v45, %v489_v44 }
  0x24   : > { %v275_v2 = vld [vmem:[%s7368_s1 + $0x2c0] sm:$0xff]  ;;  %v380_v5 = vld [vmem:[%s7368_s1 + $0x2c8] sm:$0xff]  ;;  %v592_v47 = vld [vmem:[%s7368_s1 + $0x4d8] sm:$0xff] }
  0x25   : > { %v292_v6 = vld [vmem:[%s7368_s1 + $0x700] sm:$0xff]  ;;  %v397_v8 = vld [vmem:[%s7368_s1 + $0x708] sm:$0xff]  ;;  %v5312_v10 = vpack.c.bf16 %v275_v2, %v274_v1  ;;  %5311 = vmatprep.subr.bf16.mxu0 %v5310_v0  ;;  %v5344_v12 = vpack.c.bf16 %v380_v5, %v379_v3  ;;  %5343 = vmatprep.subr.bf16.mxu1 %v5342_v4  ;;  %v473_v51 = vld [vmem:[%s7368_s1 + $0x90] sm:$0xff]  ;;  %v5390_v54 = vpack.c.bf16 %v592_v47, %v591_v46 }
  0x26   : > { %v293_v7 = vld [vmem:[%s7368_s1 + $0x740] sm:$0xff]  ;;  %v398_v9 = vld [vmem:[%s7368_s1 + $0x748] sm:$0xff]  ;;  %v474_v52 = vld [vmem:[%s7368_s1 + $0xd0] sm:$0xff] }
  0x27   : > { %v276_v11 = vld [vmem:[%s7368_s1 + $0x300] sm:$0xff]  ;;  %v5314_v13 = vpack.c.bf16 %v293_v7, %v292_v6  ;;  %v381_v15 = vld [vmem:[%s7368_s1 + $0x308] sm:$0xff]  ;;  %v5346_v17 = vpack.c.bf16 %v398_v9, %v397_v8  ;;  %5313 = vmatpush3.bf16.msra.mxu0 %v5312_v10  ;;  %5345 = vmatpush3.bf16.msra.mxu1 %v5344_v12  ;;  %v575_v53 = vld [vmem:[%s7368_s1 + $0x98] sm:$0xff]  ;;  %v5360_v60 = vpack.c.bf16 %v474_v52, %v473_v51 }
  0x28   : > { %v277_v14 = vld [vmem:[%s7368_s1 + $0x340] sm:$0xff]  ;;  %v382_v18 = vld [vmem:[%s7368_s1 + $0x348] sm:$0xff]  ;;  %v576_v55 = vld [vmem:[%s7368_s1 + $0xd8] sm:$0xff] }
  0x29   : > { %v5872_v16 = vld [vmem:[%s253_s15] sm:$0xff]  ;;  %v399_v22 = vld [vmem:[%s7368_s1 + $0x788] sm:$0xff]  ;;  %v5316_v24 = vpack.c.bf16 %v277_v14, %v276_v11  ;;  %5315 = vmatprep.subr.bf16.mxu0 %v5314_v13  ;;  %v5348_v25 = vpack.c.bf16 %v382_v18, %v381_v15  ;;  %5347 = vmatprep.subr.bf16.mxu1 %v5346_v17  ;;  %v491_v56 = vld [vmem:[%s7368_s1 + $0x510] sm:$0xff]  ;;  %v5392_v61 = vpack.c.bf16 %v576_v55, %v575_v53  ;;  %s5644_s15 = smov 97  }
  0x2a   : > { %v294_v19 = vld [vmem:[%s7368_s1 + $0x780] sm:$0xff]  ;;  %v5885_v21 = vcombine.high %v5872_v16, %v5872_v16  ;;  %v400_v23 = vld [vmem:[%s7368_s1 + $0x7c8] sm:$0xff]  ;;  %v492_v57 = vld [vmem:[%s7368_s1 + $0x550] sm:$0xff] }
  0x2b   : > { %v295_v20 = vld [vmem:[%s7368_s1 + $0x7c0] sm:$0xff]  ;;  %v383_v29 = vld [vmem:[%s7368_s1 + $0x388] sm:$0xff]  ;;  %v5350_v30 = vpack.c.bf16 %v400_v23, %v399_v22  ;;  %5317 = vmatpush3.bf16.msra.mxu0 %v5316_v24  ;;  %5349 = vmatpush3.bf16.msra.mxu1 %v5348_v25  ;;  %v593_v58 = vld [vmem:[%s7368_s1 + $0x518] sm:$0xff]  ;;  %v5362_v62 = vpack.c.bf16 %v492_v57, %v491_v56 }
  0x2c   : > { %363 = vmatprep.mubr.f32.mxu0 %v5885_v21  ;;  %v5318_v26 = vpack.c.bf16 %v295_v20, %v294_v19  ;;  %v278_v27 = vld [vmem:[%s7368_s1 + $0x380] sm:$0xff]  ;;  %v384_v31 = vld [vmem:[%s7368_s1 + $0x3c8] sm:$0xff]  ;;  %465 = vmatprep.mubr.f32.mxu1 %v5885_v21  ;;  %v594_v59 = vld [vmem:[%s7368_s1 + $0x558] sm:$0xff] }
  0x2d   : > { %v279_v28 = vld [vmem:[%s7368_s1 + $0x3c0] sm:$0xff]  ;;  %v5352_v37 = vpack.c.bf16 %v384_v31, %v383_v29  ;;  %5351 = vmatprep.subr.bf16.mxu1 %v5350_v30  ;;  %v475_v63 = vld [vmem:[%s7368_s1 + $0x110] sm:$0xff]  ;;  %v577_v1 = vld [vmem:[%s7368_s1 + $0x118] sm:$0xff]  ;;  %v5394_v2 = vpack.c.bf16 %v594_v59, %v593_v58 }
  0x2e   : > { %v5320_v36 = vpack.c.bf16 %v279_v28, %v278_v27  ;;  %5319 = vmatprep.subr.bf16.mxu0 %v5318_v26  ;;  %v476_v0 = vld [vmem:[%s7368_s1 + $0x150] sm:$0xff]  ;;  %v578_v3 = vld [vmem:[%s7368_s1 + $0x158] sm:$0xff] }
  0x2f   : > { %5353 = vmatpush3.bf16.msra.mxu1 %v5352_v37  ;;  %v493_v4 = vld [vmem:[%s7368_s1 + $0x590] sm:$0xff]  ;;  %v595_v6 = vld [vmem:[%s7368_s1 + $0x598] sm:$0xff]  ;;  %v5364_v8 = vpack.c.bf16 %v476_v0, %v475_v63  ;;  %v5396_v9 = vpack.c.bf16 %v578_v3, %v577_v1  ;;  %v692_v3 = vld [vmem:[%s7368_s1 + $0x460] sm:$0xff] }
  0x30   : > { %5321 = vmatpush3.bf16.msra.mxu0 %v5320_v36  ;;  %5387 = vmatprep.subr.bf16.mxu1 %v5386_v42  ;;  %v494_v5 = vld [vmem:[%s7368_s1 + $0x5d0] sm:$0xff]  ;;  %v596_v7 = vld [vmem:[%s7368_s1 + $0x5d8] sm:$0xff] }
  0x31   : > { %5355 = vmatprep.subr.bf16.mxu0 %v5354_v38  ;;  %v5366_v10 = vpack.c.bf16 %v494_v5, %v493_v4  ;;  %v477_v11 = vld [vmem:[%s7368_s1 + $0x190] sm:$0xff]  ;;  %v579_v13 = vld [vmem:[%s7368_s1 + $0x198] sm:$0xff]  ;;  %v5398_v14 = vpack.c.bf16 %v596_v7, %v595_v6  ;;  %v793_v4 = vld [vmem:[%s7368_s1 + $0x428] sm:$0xff] }
  0x32   : > { %466 = vmatmul.mubr.f32.vlgmr.msra.gmra.mrb[0].mxu1 %v5872_v16  ;;  %v478_v12 = vld [vmem:[%s7368_s1 + $0x1d0] sm:$0xff]  ;;  %v580_v15 = vld [vmem:[%s7368_s1 + $0x1d8] sm:$0xff]  ;;  %v794_v5 = vld [vmem:[%s7368_s1 + $0x468] sm:$0xff] }
  0x33   : > { %364 = vmatmul.mubr.f32.vlgmr.msra.gmra.mrb[0].mxu0 %v5872_v16  ;;  %5389 = vmatpush3.bf16.msra.mxu1 %v5388_v49  ;;  %v495_v17 = vld [vmem:[%s7368_s1 + $0x610] sm:$0xff]  ;;  %v597_v19 = vld [vmem:[%s7368_s1 + $0x618] sm:$0xff]  ;;  %v5368_v22 = vpack.c.bf16 %v478_v12, %v477_v11  ;;  %v5400_v23 = vpack.c.bf16 %v580_v15, %v579_v13  ;;  %v777_v11 = vld [vmem:[%s7368_s1 + $0x28] sm:$0xff]  ;;  %v5450_v12 = vpack.c.bf16 %v794_v5, %v793_v4 }
  0x34   : > { %5357 = vmatpush3.bf16.msra.mxu0 %v5356_v48  ;;  %5391 = vmatprep.subr.bf16.mxu1 %v5390_v54  ;;  %v496_v18 = vld [vmem:[%s7368_s1 + $0x650] sm:$0xff]  ;;  %v598_v20 = vld [vmem:[%s7368_s1 + $0x658] sm:$0xff]  ;;  %v778_v13 = vld [vmem:[%s7368_s1 + $0x68] sm:$0xff] }
  0x35   : > { %5359 = vmatprep.subr.bf16.mxu0 %v5358_v50  ;;  %567 = vmatprep.mubr.f32.mxu0 %v5885_v21  ;;  %v5370_v24 = vpack.c.bf16 %v496_v18, %v495_v17  ;;  %v479_v25 = vld [vmem:[%s7368_s1 + $0x210] sm:$0xff]  ;;  %v581_v27 = vld [vmem:[%s7368_s1 + $0x218] sm:$0xff]  ;;  %v5402_v28 = vpack.c.bf16 %v598_v20, %v597_v19  ;;  %v694_v15 = vld [vmem:[%s7368_s1 + $0x4e0] sm:$0xff]  ;;  %v5452_v20 = vpack.c.bf16 %v778_v13, %v777_v11 }
  0x36   : > { %669 = vmatprep.mubr.f32.mxu1 %v5885_v21  ;;  %v480_v26 = vld [vmem:[%s7368_s1 + $0x250] sm:$0xff]  ;;  %v582_v29 = vld [vmem:[%s7368_s1 + $0x258] sm:$0xff]  ;;  %v795_v17 = vld [vmem:[%s7368_s1 + $0x4a8] sm:$0xff] }
  0x37   : > { %5393 = vmatpush3.bf16.msra.mxu1 %v5392_v61  ;;  %v497_v30 = vld [vmem:[%s7368_s1 + $0x690] sm:$0xff]  ;;  %v599_v32 = vld [vmem:[%s7368_s1 + $0x698] sm:$0xff]  ;;  %v5372_v34 = vpack.c.bf16 %v480_v26, %v479_v25  ;;  %v5404_v35 = vpack.c.bf16 %v582_v29, %v581_v27  ;;  %v796_v18 = vld [vmem:[%s7368_s1 + $0x4e8] sm:$0xff] }
  0x38   : > { %5361 = vmatpush3.bf16.msra.mxu0 %v5360_v60  ;;  %5395 = vmatprep.subr.bf16.mxu1 %v5394_v2  ;;  %v498_v31 = vld [vmem:[%s7368_s1 + $0x6d0] sm:$0xff]  ;;  %v600_v33 = vld [vmem:[%s7368_s1 + $0x6d8] sm:$0xff]  ;;  %v691_v2 = vld [vmem:[%s7368_s1 + $0x420] sm:$0xff]  ;;  %v5454_v26 = vpack.c.bf16 %v796_v18, %v795_v17 }
  0x39   : > { %5363 = vmatprep.subr.bf16.mxu0 %v5362_v62  ;;  %v5374_v36 = vpack.c.bf16 %v498_v31, %v497_v30  ;;  %v481_v37 = vld [vmem:[%s7368_s1 + $0x290] sm:$0xff]  ;;  %v583_v39 = vld [vmem:[%s7368_s1 + $0x298] sm:$0xff]  ;;  %v5406_v40 = vpack.c.bf16 %v600_v33, %v599_v32  ;;  %v779_v25 = vld [vmem:[%s7368_s1 + $0xa8] sm:$0xff] }
  0x3a   : > { %v482_v38 = vld [vmem:[%s7368_s1 + $0x2d0] sm:$0xff]  ;;  %v584_v41 = vld [vmem:[%s7368_s1 + $0x2d8] sm:$0xff]  ;;  %v780_v27 = vld [vmem:[%s7368_s1 + $0xe8] sm:$0xff] }
  0x3b   : > { %5397 = vmatpush3.bf16.msra.mxu1 %v5396_v9  ;;  %v499_v42 = vld [vmem:[%s7368_s1 + $0x710] sm:$0xff]  ;;  %v601_v44 = vld [vmem:[%s7368_s1 + $0x718] sm:$0xff]  ;;  %v5376_v46 = vpack.c.bf16 %v482_v38, %v481_v37  ;;  %v5408_v47 = vpack.c.bf16 %v584_v41, %v583_v39  ;;  %v675_v9 = vld [vmem:[%s7368_s1 + $0x20] sm:$0xff]  ;;  %v5456_v33 = vpack.c.bf16 %v780_v27, %v779_v25 }
  0x3c   : > { %5365 = vmatpush3.bf16.msra.mxu0 %v5364_v8  ;;  %5399 = vmatprep.subr.bf16.mxu1 %v5398_v14  ;;  %v500_v43 = vld [vmem:[%s7368_s1 + $0x750] sm:$0xff]  ;;  %v602_v45 = vld [vmem:[%s7368_s1 + $0x758] sm:$0xff]  ;;  %v5418_v8 = vpack.c.bf16 %v692_v3, %v691_v2  ;;  %v693_v14 = vld [vmem:[%s7368_s1 + $0x4a0] sm:$0xff] }
  0x3d   : > { %5367 = vmatprep.subr.bf16.mxu0 %v5366_v10  ;;  %v5378_v48 = vpack.c.bf16 %v500_v43, %v499_v42  ;;  %v483_v49 = vld [vmem:[%s7368_s1 + $0x310] sm:$0xff]  ;;  %v585_v51 = vld [vmem:[%s7368_s1 + $0x318] sm:$0xff]  ;;  %v5410_v52 = vpack.c.bf16 %v602_v45, %v601_v44  ;;  %v676_v10 = vld [vmem:[%s7368_s1 + $0x60] sm:$0xff] }
  0x3e   : > { %v484_v50 = vld [vmem:[%s7368_s1 + $0x350] sm:$0xff]  ;;  %v586_v53 = vld [vmem:[%s7368_s1 + $0x358] sm:$0xff]  ;;  %v5420_v19 = vpack.c.bf16 %v676_v10, %v675_v9  ;;  %v696_v29 = vld [vmem:[%s7368_s1 + $0x560] sm:$0xff] }
  0x3f   : > { %5401 = vmatpush3.bf16.msra.mxu1 %v5400_v23  ;;  %v501_v54 = vld [vmem:[%s7368_s1 + $0x790] sm:$0xff]  ;;  %v603_v56 = vld [vmem:[%s7368_s1 + $0x798] sm:$0xff]  ;;  %v5380_v58 = vpack.c.bf16 %v484_v50, %v483_v49  ;;  %v5412_v59 = vpack.c.bf16 %v586_v53, %v585_v51  ;;  %v677_v23 = vld [vmem:[%s7368_s1 + $0xa0] sm:$0xff] }
  0x40   : > { %5369 = vmatpush3.bf16.msra.mxu0 %v5368_v22  ;;  %5403 = vmatprep.subr.bf16.mxu1 %v5402_v28  ;;  %v502_v55 = vld [vmem:[%s7368_s1 + $0x7d0] sm:$0xff]  ;;  %v604_v57 = vld [vmem:[%s7368_s1 + $0x7d8] sm:$0xff]  ;;  %v5422_v22 = vpack.c.bf16 %v694_v15, %v693_v14  ;;  %v695_v28 = vld [vmem:[%s7368_s1 + $0x520] sm:$0xff] }
  0x41   : > { %5371 = vmatprep.subr.bf16.mxu0 %v5370_v24  ;;  %v5382_v60 = vpack.c.bf16 %v502_v55, %v501_v54  ;;  %v485_v61 = vld [vmem:[%s7368_s1 + $0x390] sm:$0xff]  ;;  %v587_v63 = vld [vmem:[%s7368_s1 + $0x398] sm:$0xff]  ;;  %v5414_v0 = vpack.c.bf16 %v604_v57, %v603_v56  ;;  %v678_v24 = vld [vmem:[%s7368_s1 + $0xe0] sm:$0xff] }
  0x42   : > { %v486_v62 = vld [vmem:[%s7368_s1 + $0x3d0] sm:$0xff]  ;;  %v588_v1 = vld [vmem:[%s7368_s1 + $0x3d8] sm:$0xff]  ;;  %v797_v30 = vld [vmem:[%s7368_s1 + $0x528] sm:$0xff]  ;;  %v5424_v32 = vpack.c.bf16 %v678_v24, %v677_v23 }
  0x43   : > { %5405 = vmatpush3.bf16.msra.mxu1 %v5404_v35  ;;  %v5384_v6 = vpack.c.bf16 %v486_v62, %v485_v61  ;;  %v5416_v7 = vpack.c.bf16 %v588_v1, %v587_v63  ;;  %v798_v31 = vld [vmem:[%s7368_s1 + $0x568] sm:$0xff]  ;;  %v679_v35 = vld [vmem:[%s7368_s1 + $0x120] sm:$0xff] }
  0x44   : > { %5373 = vmatpush3.bf16.msra.mxu0 %v5372_v34  ;;  %5407 = vmatprep.subr.bf16.mxu1 %v5406_v40  ;;  %v5426_v34 = vpack.c.bf16 %v696_v29, %v695_v28  ;;  %v781_v37 = vld [vmem:[%s7368_s1 + $0x128] sm:$0xff]  ;;  %v5458_v38 = vpack.c.bf16 %v798_v31, %v797_v30  ;;  %v697_v40 = vld [vmem:[%s7368_s1 + $0x5a0] sm:$0xff] }
  0x45   : > { %5375 = vmatprep.subr.bf16.mxu0 %v5374_v36  ;;  %v680_v36 = vld [vmem:[%s7368_s1 + $0x160] sm:$0xff]  ;;  %v782_v39 = vld [vmem:[%s7368_s1 + $0x168] sm:$0xff] }
  0x46   : > { %v698_v41 = vld [vmem:[%s7368_s1 + $0x5e0] sm:$0xff]  ;;  %v799_v42 = vld [vmem:[%s7368_s1 + $0x5a8] sm:$0xff]  ;;  %v5428_v44 = vpack.c.bf16 %v680_v36, %v679_v35  ;;  %v5460_v45 = vpack.c.bf16 %v782_v39, %v781_v37  ;;  %v896_v39 = vld [vmem:[%s7368_s1 + $0x470] sm:$0xff] }
  0x47   : > { %5409 = vmatpush3.bf16.msra.mxu1 %v5408_v47  ;;  %v800_v43 = vld [vmem:[%s7368_s1 + $0x5e8] sm:$0xff]  ;;  %v681_v47 = vld [vmem:[%s7368_s1 + $0x1a0] sm:$0xff] }
  0x48   : > { %5377 = vmatpush3.bf16.msra.mxu0 %v5376_v46  ;;  %5411 = vmatprep.subr.bf16.mxu1 %v5410_v52  ;;  %v5430_v46 = vpack.c.bf16 %v698_v41, %v697_v40  ;;  %v783_v49 = vld [vmem:[%s7368_s1 + $0x1a8] sm:$0xff]  ;;  %v5462_v50 = vpack.c.bf16 %v800_v43, %v799_v42  ;;  %v699_v52 = vld [vmem:[%s7368_s1 + $0x620] sm:$0xff]  ;;  %v997_v40 = vld [vmem:[%s7368_s1 + $0x438] sm:$0xff] }
  0x49   : > { %5379 = vmatprep.subr.bf16.mxu0 %v5378_v48  ;;  %v682_v48 = vld [vmem:[%s7368_s1 + $0x1e0] sm:$0xff]  ;;  %v784_v51 = vld [vmem:[%s7368_s1 + $0x1e8] sm:$0xff]  ;;  %v998_v41 = vld [vmem:[%s7368_s1 + $0x478] sm:$0xff] }
  0x4a   : > { %v700_v53 = vld [vmem:[%s7368_s1 + $0x660] sm:$0xff]  ;;  %v801_v54 = vld [vmem:[%s7368_s1 + $0x628] sm:$0xff]  ;;  %v5432_v56 = vpack.c.bf16 %v682_v48, %v681_v47  ;;  %v5464_v57 = vpack.c.bf16 %v784_v51, %v783_v49  ;;  %v880_v47 = vld [vmem:[%s7368_s1 + $0x70] sm:$0xff]  ;;  %v5514_v48 = vpack.c.bf16 %v998_v41, %v997_v40 }
  0x4b   : > { %5413 = vmatpush3.bf16.msra.mxu1 %v5412_v59  ;;  %v802_v55 = vld [vmem:[%s7368_s1 + $0x668] sm:$0xff]  ;;  %v683_v59 = vld [vmem:[%s7368_s1 + $0x220] sm:$0xff]  ;;  %v982_v49 = vld [vmem:[%s7368_s1 + $0x78] sm:$0xff] }
  0x4c   : > { %5381 = vmatpush3.bf16.msra.mxu0 %v5380_v58  ;;  %5415 = vmatprep.subr.bf16.mxu1 %v5414_v0  ;;  %v5434_v58 = vpack.c.bf16 %v700_v53, %v699_v52  ;;  %v785_v61 = vld [vmem:[%s7368_s1 + $0x228] sm:$0xff]  ;;  %v5466_v62 = vpack.c.bf16 %v802_v55, %v801_v54  ;;  %v701_v0 = vld [vmem:[%s7368_s1 + $0x6a0] sm:$0xff]  ;;  %v898_v51 = vld [vmem:[%s7368_s1 + $0x4f0] sm:$0xff] }
  0x4d   : > { %5383 = vmatprep.subr.bf16.mxu0 %v5382_v60  ;;  %v684_v60 = vld [vmem:[%s7368_s1 + $0x260] sm:$0xff]  ;;  %v786_v63 = vld [vmem:[%s7368_s1 + $0x268] sm:$0xff]  ;;  %v999_v52 = vld [vmem:[%s7368_s1 + $0x4b8] sm:$0xff] }
  0x4e   : > { %v702_v1 = vld [vmem:[%s7368_s1 + $0x6e0] sm:$0xff]  ;;  %v803_v2 = vld [vmem:[%s7368_s1 + $0x6a8] sm:$0xff]  ;;  %v5436_v4 = vpack.c.bf16 %v684_v60, %v683_v59  ;;  %v5468_v5 = vpack.c.bf16 %v786_v63, %v785_v61  ;;  %v1000_v53 = vld [vmem:[%s7368_s1 + $0x4f8] sm:$0xff] }
  0x4f   : > { %5417 = vmatpush3.bf16.msra.mxu1 %v5416_v7  ;;  %v804_v3 = vld [vmem:[%s7368_s1 + $0x6e8] sm:$0xff]  ;;  %v685_v7 = vld [vmem:[%s7368_s1 + $0x2a0] sm:$0xff]  ;;  %v882_v59 = vld [vmem:[%s7368_s1 + $0xf0] sm:$0xff]  ;;  %v5518_v60 = vpack.c.bf16 %v1000_v53, %v999_v52 }
  0x50   : > { %5385 = vmatpush3.bf16.msra.mxu0 %v5384_v6  ;;  %5451 = vmatprep.subr.bf16.mxu1 %v5450_v12  ;;  %v5438_v6 = vpack.c.bf16 %v702_v1, %v701_v0  ;;  %v787_v9 = vld [vmem:[%s7368_s1 + $0x2a8] sm:$0xff]  ;;  %v5470_v10 = vpack.c.bf16 %v804_v3, %v803_v2  ;;  %v703_v12 = vld [vmem:[%s7368_s1 + $0x720] sm:$0xff]  ;;  %v984_v61 = vld [vmem:[%s7368_s1 + $0xf8] sm:$0xff] }
  0x51   : > { %5419 = vmatprep.subr.bf16.mxu0 %v5418_v8  ;;  %v686_v8 = vld [vmem:[%s7368_s1 + $0x2e0] sm:$0xff]  ;;  %v788_v11 = vld [vmem:[%s7368_s1 + $0x2e8] sm:$0xff]  ;;  %v900_v63 = vld [vmem:[%s7368_s1 + $0x570] sm:$0xff] }
  0x52   : > { %670 = vmatmul.mubr.f32.vlgmr.msra.gmra.mrb[2].mxu1 %v5872_v16  ;;  %v704_v13 = vld [vmem:[%s7368_s1 + $0x760] sm:$0xff]  ;;  %v805_v14 = vld [vmem:[%s7368_s1 + $0x728] sm:$0xff]  ;;  %v5440_v17 = vpack.c.bf16 %v686_v8, %v685_v7  ;;  %v5472_v18 = vpack.c.bf16 %v788_v11, %v787_v9  ;;  %v1001_v0 = vld [vmem:[%s7368_s1 + $0x538] sm:$0xff] }
  0x53   : > { %568 = vmatmul.mubr.f32.vlgmr.msra.gmra.mrb[2].mxu0 %v5872_v16  ;;  %5453 = vmatpush3.bf16.msra.mxu1 %v5452_v20  ;;  %v806_v15 = vld [vmem:[%s7368_s1 + $0x768] sm:$0xff]  ;;  %v687_v20 = vld [vmem:[%s7368_s1 + $0x320] sm:$0xff]  ;;  %v1002_v1 = vld [vmem:[%s7368_s1 + $0x578] sm:$0xff] }
  0x54   : > { %5421 = vmatpush3.bf16.msra.mxu0 %v5420_v19  ;;  %5455 = vmatprep.subr.bf16.mxu1 %v5454_v26  ;;  %v5442_v19 = vpack.c.bf16 %v704_v13, %v703_v12  ;;  %v789_v23 = vld [vmem:[%s7368_s1 + $0x328] sm:$0xff]  ;;  %v5474_v24 = vpack.c.bf16 %v806_v15, %v805_v14  ;;  %v705_v26 = vld [vmem:[%s7368_s1 + $0x7a0] sm:$0xff]  ;;  %v884_v7 = vld [vmem:[%s7368_s1 + $0x170] sm:$0xff]  ;;  %v5522_v8 = vpack.c.bf16 %v1002_v1, %v1001_v0 }
  0x55   : > { %5423 = vmatprep.subr.bf16.mxu0 %v5422_v22  ;;  %771 = vmatprep.mubr.f32.mxu0 %v5885_v21  ;;  %v688_v22 = vld [vmem:[%s7368_s1 + $0x360] sm:$0xff]  ;;  %v790_v25 = vld [vmem:[%s7368_s1 + $0x368] sm:$0xff]  ;;  %v986_v9 = vld [vmem:[%s7368_s1 + $0x178] sm:$0xff] }
  0x56   : > { %873 = vmatprep.mubr.f32.mxu1 %v5885_v21  ;;  %v706_v27 = vld [vmem:[%s7368_s1 + $0x7e0] sm:$0xff]  ;;  %v807_v28 = vld [vmem:[%s7368_s1 + $0x7a8] sm:$0xff]  ;;  %v5444_v30 = vpack.c.bf16 %v688_v22, %v687_v20  ;;  %v5476_v31 = vpack.c.bf16 %v790_v25, %v789_v23  ;;  %v902_v11 = vld [vmem:[%s7368_s1 + $0x5f0] sm:$0xff] }
  0x57   : > { %5457 = vmatpush3.bf16.msra.mxu1 %v5456_v33  ;;  %v808_v29 = vld [vmem:[%s7368_s1 + $0x7e8] sm:$0xff]  ;;  %v689_v33 = vld [vmem:[%s7368_s1 + $0x3a0] sm:$0xff]  ;;  %v1003_v12 = vld [vmem:[%s7368_s1 + $0x5b8] sm:$0xff] }
  0x58   : > { %5425 = vmatpush3.bf16.msra.mxu0 %v5424_v32  ;;  %5459 = vmatprep.subr.bf16.mxu1 %v5458_v38  ;;  %v5446_v32 = vpack.c.bf16 %v706_v27, %v705_v26  ;;  %v791_v35 = vld [vmem:[%s7368_s1 + $0x3a8] sm:$0xff]  ;;  %v5478_v36 = vpack.c.bf16 %v808_v29, %v807_v28  ;;  %v895_v38 = vld [vmem:[%s7368_s1 + $0x430] sm:$0xff]  ;;  %v1004_v13 = vld [vmem:[%s7368_s1 + $0x5f8] sm:$0xff] }
  0x59   : > { %5427 = vmatprep.subr.bf16.mxu0 %v5426_v34  ;;  %v690_v34 = vld [vmem:[%s7368_s1 + $0x3e0] sm:$0xff]  ;;  %v792_v37 = vld [vmem:[%s7368_s1 + $0x3e8] sm:$0xff]  ;;  %v886_v20 = vld [vmem:[%s7368_s1 + $0x1f0] sm:$0xff] }
  0x5a   : > { %v5448_v42 = vpack.c.bf16 %v690_v34, %v689_v33  ;;  %v5480_v43 = vpack.c.bf16 %v792_v37, %v791_v35  ;;  %v988_v22 = vld [vmem:[%s7368_s1 + $0x1f8] sm:$0xff]  ;;  %v903_v23 = vld [vmem:[%s7368_s1 + $0x630] sm:$0xff] }
  0x5b   : > { %5461 = vmatpush3.bf16.msra.mxu1 %v5460_v45  ;;  %v5482_v45 = vpack.c.bf16 %v896_v39, %v895_v38  ;;  %v1005_v25 = vld [vmem:[%s7368_s1 + $0x638] sm:$0xff]  ;;  %v905_v35 = vld [vmem:[%s7368_s1 + $0x6b0] sm:$0xff] }
  0x5c   : > { %5429 = vmatpush3.bf16.msra.mxu0 %v5428_v44  ;;  %5463 = vmatprep.subr.bf16.mxu1 %v5462_v50  ;;  %v981_v44 = vld [vmem:[%s7368_s1 + $0x38] sm:$0xff]  ;;  %v897_v50 = vld [vmem:[%s7368_s1 + $0x4b0] sm:$0xff] }
  0x5d   : > { %5431 = vmatprep.subr.bf16.mxu0 %v5430_v46  ;;  %v879_v46 = vld [vmem:[%s7368_s1 + $0x30] sm:$0xff]  ;;  %v5516_v55 = vpack.c.bf16 %v982_v49, %v981_v44  ;;  %v1006_v26 = vld [vmem:[%s7368_s1 + $0x678] sm:$0xff] }
  0x5e   : > { %v5484_v54 = vpack.c.bf16 %v880_v47, %v879_v46  ;;  %v989_v29 = vld [vmem:[%s7368_s1 + $0x238] sm:$0xff]  ;;  %v5530_v33 = vpack.c.bf16 %v1006_v26, %v1005_v25  ;;  %v890_v44 = vld [vmem:[%s7368_s1 + $0x2f0] sm:$0xff] }
  0x5f   : > { %5465 = vmatpush3.bf16.msra.mxu1 %v5464_v57  ;;  %v5486_v57 = vpack.c.bf16 %v898_v51, %v897_v50  ;;  %v990_v34 = vld [vmem:[%s7368_s1 + $0x278] sm:$0xff]  ;;  %v907_v47 = vld [vmem:[%s7368_s1 + $0x730] sm:$0xff] }
  0x60   : > { %5433 = vmatpush3.bf16.msra.mxu0 %v5432_v56  ;;  %5467 = vmatprep.subr.bf16.mxu1 %v5466_v62  ;;  %v983_v56 = vld [vmem:[%s7368_s1 + $0xb8] sm:$0xff]  ;;  %v899_v62 = vld [vmem:[%s7368_s1 + $0x530] sm:$0xff]  ;;  %v5532_v40 = vpack.c.bf16 %v990_v34, %v989_v29  ;;  %v7374_v34 = vlaneseq }
  0x61   : > { %5435 = vmatprep.subr.bf16.mxu0 %v5434_v58  ;;  %v881_v58 = vld [vmem:[%s7368_s1 + $0xb0] sm:$0xff]  ;;  %v5520_v3 = vpack.c.bf16 %v984_v61, %v983_v56  ;;  %v1007_v37 = vld [vmem:[%s7368_s1 + $0x6b8] sm:$0xff] }
  0x62   : > { %v5488_v2 = vpack.c.bf16 %v882_v59, %v881_v58  ;;  %v1008_v38 = vld [vmem:[%s7368_s1 + $0x6f8] sm:$0xff]  ;;  %v892_v56 = vld [vmem:[%s7368_s1 + $0x370] sm:$0xff] }
  0x63   : > { %5469 = vmatpush3.bf16.msra.mxu1 %v5468_v5  ;;  %v5490_v5 = vpack.c.bf16 %v900_v63, %v899_v62  ;;  %v991_v41 = vld [vmem:[%s7368_s1 + $0x2b8] sm:$0xff]  ;;  %v909_v59 = vld [vmem:[%s7368_s1 + $0x7b0] sm:$0xff] }
  0x64   : > { %5437 = vmatpush3.bf16.msra.mxu0 %v5436_v4  ;;  %5471 = vmatprep.subr.bf16.mxu1 %v5470_v10  ;;  %v985_v4 = vld [vmem:[%s7368_s1 + $0x138] sm:$0xff]  ;;  %v901_v10 = vld [vmem:[%s7368_s1 + $0x5b0] sm:$0xff] }
  0x65   : > { %5439 = vmatprep.subr.bf16.mxu0 %v5438_v6  ;;  %v883_v6 = vld [vmem:[%s7368_s1 + $0x130] sm:$0xff]  ;;  %v5524_v15 = vpack.c.bf16 %v986_v9, %v985_v4  ;;  %v992_v46 = vld [vmem:[%s7368_s1 + $0x2f8] sm:$0xff] }
  0x66   : > { %v5492_v14 = vpack.c.bf16 %v884_v7, %v883_v6  ;;  %v1009_v49 = vld [vmem:[%s7368_s1 + $0x738] sm:$0xff]  ;;  %v5536_v52 = vpack.c.bf16 %v992_v46, %v991_v41 }
  0x67   : > { %5473 = vmatpush3.bf16.msra.mxu1 %v5472_v18  ;;  %v5494_v18 = vpack.c.bf16 %v902_v11, %v901_v10  ;;  %v1010_v50 = vld [vmem:[%s7368_s1 + $0x778] sm:$0xff] }
  0x68   : > { %5441 = vmatpush3.bf16.msra.mxu0 %v5440_v17  ;;  %5475 = vmatprep.subr.bf16.mxu1 %v5474_v24  ;;  %v987_v17 = vld [vmem:[%s7368_s1 + $0x1b8] sm:$0xff]  ;;  %v904_v24 = vld [vmem:[%s7368_s1 + $0x670] sm:$0xff] }
  0x69   : > { %5443 = vmatprep.subr.bf16.mxu0 %v5442_v19  ;;  %v885_v19 = vld [vmem:[%s7368_s1 + $0x1b0] sm:$0xff]  ;;  %v5528_v28 = vpack.c.bf16 %v988_v22, %v987_v17  ;;  %v993_v53 = vld [vmem:[%s7368_s1 + $0x338] sm:$0xff] }
  0x6a   : > { %v5496_v27 = vpack.c.bf16 %v886_v20, %v885_v19  ;;  %v994_v58 = vld [vmem:[%s7368_s1 + $0x378] sm:$0xff] }
  0x6b   : > { %5477 = vmatpush3.bf16.msra.mxu1 %v5476_v31  ;;  %v887_v31 = vld [vmem:[%s7368_s1 + $0x230] sm:$0xff]  ;;  %v1011_v61 = vld [vmem:[%s7368_s1 + $0x7b8] sm:$0xff]  ;;  %v5540_v0 = vpack.c.bf16 %v994_v58, %v993_v53 }
  0x6c   : > { %5445 = vmatpush3.bf16.msra.mxu0 %v5444_v30  ;;  %5479 = vmatprep.subr.bf16.mxu1 %v5478_v36  ;;  %v5498_v30 = vpack.c.bf16 %v904_v24, %v903_v23  ;;  %v906_v36 = vld [vmem:[%s7368_s1 + $0x6f0] sm:$0xff]  ;;  %v1012_v62 = vld [vmem:[%s7368_s1 + $0x7f8] sm:$0xff] }
  0x6d   : > { %5447 = vmatprep.subr.bf16.mxu0 %v5446_v32  ;;  %v888_v32 = vld [vmem:[%s7368_s1 + $0x270] sm:$0xff]  ;;  %v5542_v4 = vpack.c.bf16 %v1012_v62, %v1011_v61  ;;  %v996_v6 = vld [vmem:[%s7368_s1 + $0x3f8] sm:$0xff] }
  0x6e   : > { %v5500_v39 = vpack.c.bf16 %v888_v32, %v887_v31 }
  0x6f   : > { %5481 = vmatpush3.bf16.msra.mxu1 %v5480_v43  ;;  %v889_v43 = vld [vmem:[%s7368_s1 + $0x2b0] sm:$0xff] }
  0x70   : > { %5449 = vmatpush3.bf16.msra.mxu0 %v5448_v42  ;;  %5515 = vmatprep.subr.bf16.mxu1 %v5514_v48  ;;  %v5502_v42 = vpack.c.bf16 %v906_v36, %v905_v35  ;;  %v908_v48 = vld [vmem:[%s7368_s1 + $0x770] sm:$0xff]  ;;  %v5504_v51 = vpack.c.bf16 %v890_v44, %v889_v43 }
  0x71   : > { %5483 = vmatprep.subr.bf16.mxu0 %v5482_v45  ;;  %v5534_v45 = vpack.c.bf16 %v1008_v38, %v1007_v37  ;;  %v4874_v35 = vld [vmem:[%s7369_s2 + $0x1] ss:$8 sm:$0xf]  ;;  %v6592_v37 = vshrl.u32 %v7374_v34, 7 }
  0x72   : > { %874 = vmatmul.mubr.f32.vlgmr.msra.gmra.mrb[4].mxu1 %v5872_v16  ;;  %v4875_v36 = vld [vmem:[%s7369_s2 + $0x1] ss:$8 sm:$0xf0] }
  0x73   : > { %772 = vmatmul.mubr.f32.vlgmr.msra.gmra.mrb[4].mxu0 %v5872_v16  ;;  %5517 = vmatpush3.bf16.msra.mxu1 %v5516_v55  ;;  %v891_v55 = vld [vmem:[%s7368_s1 + $0x330] sm:$0xff]  ;;  %7381 = vst [vmem:[#allocation3_spill] sm:$0xff] %v6592_v37  ;;  %v6594_v38 = vor.u32 %v4875_v36, %v4874_v35 }
  0x74   : > { %5485 = vmatpush3.bf16.msra.mxu0 %v5484_v54  ;;  %5519 = vmatprep.subr.bf16.mxu1 %v5518_v60  ;;  %v5506_v54 = vpack.c.bf16 %v908_v48, %v907_v47  ;;  %v910_v60 = vld [vmem:[%s7368_s1 + $0x7f0] sm:$0xff]  ;;  %v5508_v63 = vpack.c.bf16 %v892_v56, %v891_v55 }
  0x75   : > { %5487 = vmatprep.subr.bf16.mxu0 %v5486_v57  ;;  %1077 = vmatprep.mubr.f32.mxu1 %v5885_v21  ;;  %v5538_v57 = vpack.c.bf16 %v1010_v50, %v1009_v49  ;;  %v5510_v1 = vpack.c.bf16 %v910_v60, %v909_v59  ;;  %v4901_v35 = vld [vmem:[%s7369_s2 + $0x2] ss:$8 sm:$0xf] }
  0x76   : > { %975 = vmatprep.mubr.f32.mxu0 %v5885_v21  ;;  %v5526_v21 = vpack.c.bf16 %v1004_v13, %v1003_v12  ;;  %v4902_v36 = vld [vmem:[%s7369_s2 + $0x2] ss:$8 sm:$0xf0] }
  0x77   : > { %5521 = vmatpush3.bf16.msra.mxu1 %v5520_v3  ;;  %v894_v3 = vld [vmem:[%s7368_s1 + $0x3f0] sm:$0xff] }
  0x78   : > { %5489 = vmatpush3.bf16.msra.mxu0 %v5488_v2  ;;  %5523 = vmatprep.subr.bf16.mxu1 %v5522_v8  ;;  %v893_v2 = vld [vmem:[%s7368_s1 + $0x3b0] sm:$0xff] }
  0x79   : > { %5491 = vmatprep.subr.bf16.mxu0 %v5490_v5  ;;  %v995_v5 = vld [vmem:[%s7368_s1 + $0x3b8] sm:$0xff]  ;;  %v5512_v7 = vpack.c.bf16 %v894_v3, %v893_v2 }
  0x7a   : > { %v5544_v8 = vpack.c.bf16 %v996_v6, %v995_v5 }
  0x7b   : > { %5525 = vmatpush3.bf16.msra.mxu1 %v5524_v15 }
  0x7c   : > { %5493 = vmatpush3.bf16.msra.mxu0 %v5492_v14  ;;  %5527 = vmatprep.subr.bf16.mxu1 %v5526_v21 }
  0x7d   : > { %5495 = vmatprep.subr.bf16.mxu0 %v5494_v18 }
  0x7f   : > { %5529 = vmatpush3.bf16.msra.mxu1 %v5528_v28 }
  0x80   : > { %5497 = vmatpush3.bf16.msra.mxu0 %v5496_v27  ;;  %5531 = vmatprep.subr.bf16.mxu1 %v5530_v33  ;;  %v7375_v27 = vmov 0.0  }
  0x81   : > { %5499 = vmatprep.subr.bf16.mxu0 %v5498_v30 }
  0x83   : > { %5533 = vmatpush3.bf16.msra.mxu1 %v5532_v40  ;;  %v6603_v40 = vsub.s32 1, %v6592_v37 }
  0x84   : > { %5501 = vmatpush3.bf16.msra.mxu0 %v5500_v39  ;;  %5535 = vmatprep.subr.bf16.mxu1 %v5534_v45 }
  0x85   : > { %5503 = vmatprep.subr.bf16.mxu0 %v5502_v42  ;;  %v1224_v41 = vrot.slane %v6594_v38, %v6603_v40 }
  0x87   : > { %5537 = vmatpush3.bf16.msra.mxu1 %v5536_v52  ;;  %v6653_v52 = vsub.s32 2, %v6592_v37 }
  0x88   : > { %5505 = vmatpush3.bf16.msra.mxu0 %v5504_v51  ;;  %5539 = vmatprep.subr.bf16.mxu1 %v5538_v57 }
  0x89   : > { %5507 = vmatprep.subr.bf16.mxu0 %v5506_v54  ;;  %v6658_v54 = vsub.s32 3, %v6592_v37  ;;  %v1228_v55 = vrot.slane %v6594_v38, %v6653_v52 }
  0x8b   : > { %5541 = vmatpush3.bf16.msra.mxu1 %v5540_v0  ;;  %v1232_v56 = vrot.slane %v6594_v38, %v6658_v54  ;;  %v4713_v0 = vld [vmem:[%s7371_s4] sm:$0xff] }
  0x8c   : > { %5509 = vmatpush3.bf16.msra.mxu0 %v5508_v63  ;;  %5543 = vmatprep.subr.bf16.mxu1 %v5542_v4  ;;  %v6683_v63 = vld [vmem:[%s7370_s3 + $0x8] sm:$0xff] }
  0x8d   : > { %5511 = vmatprep.subr.bf16.mxu0 %v5510_v1  ;;  %v5647_v1 = vmov 0  }
  0x8e   : > { %5628 = vset.pattern.permute.xlu0 %v5647_v1  ;;  %v6775_v1 = vsub.s32 7, %v6592_v37 }
  0x8f   : > { %5545 = vmatpush3.bf16.msra.mxu1 %v5544_v8 }
  0x90   : > { %5513 = vmatpush3.bf16.msra.mxu0 %v5512_v7 }
  0x92   : > { %1078 = vmatmul.mubr.f32.vlgmr.msra.gmra.mrb[6].mxu1 %v5872_v16 }
  0x93   : > { %976 = vmatmul.mubr.f32.vlgmr.msra.gmra.mrb[6].mxu0 %v5872_v16  ;;  %1431 = vmatprep.mubr.f32.mxu1 %v7375_v27 }
  0x94   : > { %1360 = vmatprep.mubr.f32.mxu0 %v7375_v27 }
 0x105   : > { %v5077_v10 = vpop.f32.mrb[0].mxu1 }
 0x106   : > { %v5042_v9 = vpop.f32.mrb[0].mxu0  ;;  %v5078_v13 = vpop.f32.mrb[1].mxu1 }
 0x107   : > { %v5043_v11 = vpop.f32.mrb[1].mxu0  ;;  %v6499_v14 = vadd.f32 %v5078_v13, %v5077_v10 }
 0x108   : > { %v6497_v12 = vadd.f32 %v5043_v11, %v5042_v9 }
 0x109   : > { %1096 = vrot.lane.b32.xlu1 %v6499_v14, %s5639_s12 }
 0x10a   : > { %1181 = vrot.lane.b32.xlu0 %v6497_v12, %s5638_s11 }
 0x10d   : > { %1896 = vrot.lane.b32.xlu1 %v6499_v14, %s5640_s27 }
 0x10e   : > { %1183 = vrot.lane.b32.xlu0 %v6499_v14, %s5638_s11 }
 0x111   : > { %2304 = vrot.lane.b32.xlu1 %v6499_v14, %s5641_s13 }
 0x112   : > { %1094 = vrot.lane.b32.xlu0 %v6497_v12, %s5639_s12 }
 0x116   : > { %1894 = vrot.lane.b32.xlu0 %v6497_v12, %s5640_s27 }
 0x11a   : > { %2302 = vrot.lane.b32.xlu0 %v6497_v12, %s5641_s13 }
 0x11e   : > { %3083 = vrot.lane.b32.xlu0 %v6499_v14, %s5642_s14 }
 0x122   : > { %3081 = vrot.lane.b32.xlu0 %v6497_v12, %s5642_s14 }
 0x125   : > { %v5147_v15 = vpop.f32.mrb[2].mxu1 }
 0x126   : > { %v5112_v16 = vpop.f32.mrb[2].mxu0  ;;  %v5148_v19 = vpop.f32.mrb[3].mxu1 }
 0x127   : > { %v5113_v17 = vpop.f32.mrb[3].mxu0  ;;  %v6523_v20 = vadd.f32 %v5148_v19, %v5147_v15  ;;  %v1126_v19 = vld [vmem:[%s7369_s2] ss:$8 sm:$0xf0] }
 0x128   : > { %v6521_v18 = vadd.f32 %v5113_v17, %v5112_v16  ;;  %v1125_v17 = vld [vmem:[%s7369_s2] ss:$8 sm:$0xf] }
 0x129   : > { %1187 = vrot.lane.b32.xlu0 %v6523_v20, %s5638_s11 }
 0x12a   : > { %1185 = vrot.lane.b32.xlu1 %v6521_v18, %s5638_s11 }
 0x12d   : > { %1100 = vrot.lane.b32.xlu0 %v6523_v20, %s5639_s12 }
 0x12e   : > { %1098 = vrot.lane.b32.xlu1 %v6521_v18, %s5639_s12 }
 0x131   : > { %1900 = vrot.lane.b32.xlu0 %v6523_v20, %s5640_s27 }
 0x132   : > { %1898 = vrot.lane.b32.xlu1 %v6521_v18, %s5640_s27 }
 0x135   : > { %2308 = vrot.lane.b32.xlu0 %v6523_v20, %s5641_s13 }
 0x136   : > { %2306 = vrot.lane.b32.xlu1 %v6521_v18, %s5641_s13 }
 0x13a   : > { %3085 = vrot.lane.b32.xlu1 %v6521_v18, %s5642_s14 }
 0x145   : > { %v5217_v22 = vpop.f32.mrb[4].mxu1 }
 0x146   : > { %v5182_v21 = vpop.f32.mrb[4].mxu0  ;;  %v5218_v25 = vpop.f32.mrb[5].mxu1 }
 0x147   : > { %v5183_v23 = vpop.f32.mrb[5].mxu0  ;;  %v6545_v26 = vadd.f32 %v5218_v25, %v5217_v22  ;;  %v6738_v25 = vor.u32 %v1126_v19, %v1125_v17 }
 0x148   : > { %v6543_v24 = vadd.f32 %v5183_v23, %v5182_v21  ;;  %v6732_v21 = vsub.s32 0, %v6592_v37 }
 0x149   : > { %1191 = vrot.lane.b32.xlu0 %v6545_v26, %s5638_s11 }
 0x14a   : > { %1189 = vrot.lane.b32.xlu1 %v6543_v24, %s5638_s11  ;;  %v1132_v17 = vrot.slane %v6738_v25, %v6732_v21 }
 0x14d   : > { %1104 = vrot.lane.b32.xlu0 %v6545_v26, %s5639_s12 }
 0x14e   : > { %1102 = vrot.lane.b32.xlu1 %v6543_v24, %s5639_s12 }
 0x151   : > { %1904 = vrot.lane.b32.xlu0 %v6545_v26, %s5640_s27 }
 0x152   : > { %1902 = vrot.lane.b32.xlu1 %v6543_v24, %s5640_s27 }
 0x155   : > { %2312 = vrot.lane.b32.xlu0 %v6545_v26, %s5641_s13 }
 0x156   : > { %2310 = vrot.lane.b32.xlu1 %v6543_v24, %s5641_s13 }
 0x165   : > { %v5287_v29 = vpop.f32.mrb[6].mxu1 }
 0x166   : > { %v5252_v28 = vpop.f32.mrb[6].mxu0  ;;  %v5288_v31 = vpop.f32.mrb[7].mxu1 }
 0x167   : > { %v5253_v30 = vpop.f32.mrb[7].mxu0  ;;  %v6567_v33 = vadd.f32 %v5288_v31, %v5287_v29  ;;  %v6744_v29 = vsub.s32 4, %v6592_v37 }
 0x168   : > { %v6565_v32 = vadd.f32 %v5253_v30, %v5252_v28  ;;  %v6741_v28 = vsub.s32 5, %v6592_v37  ;;  %v1220_v30 = vrot.slane %v6594_v38, %v6732_v21 }
 0x169   : > { %1178 = vrot.lane.b32.xlu1 %v6567_v33, %s5638_s11  ;;  %1084 = vrot.lane.b32.xlu0 %v6567_v33, %s5639_s12 }
 0x16a   : > { %7380 = vst [vmem:[#allocation2_spill] sm:$0xff] %v6565_v32  ;;  %v1240_v31 = vrot.slane %v6594_v38, %v6741_v28 }
 0x16d   : > { %3087 = vrot.lane.b32.xlu1 %v6523_v20, %s5642_s14  ;;  %3089 = vrot.lane.b32.xlu0 %v6543_v24, %s5642_s14 }
 0x171   : > { %1193 = vrot.lane.b32.xlu1 %v6565_v32, %s5638_s11  ;;  %1891 = vrot.lane.b32.xlu0 %v6567_v33, %s5640_s27 }
 0x175   : > { %3091 = vrot.lane.b32.xlu1 %v6545_v26, %s5642_s14  ;;  %3491 = vrot.lane.b32.xlu0 %v6499_v14, %s5644_s15 }
 0x179   : > { %1106 = vrot.lane.b32.xlu1 %v6565_v32, %s5639_s12  ;;  %2299 = vrot.lane.b32.xlu0 %v6567_v33, %s5641_s13  ;;  %s7348_s12 = scalar_lea.vmem %s7372_s5, %s5009_s9 }
 0x17b   : > { %v6630_v47 = vpop.permute.xlu1 %1096 }
 0x17c   : > { %v6600_v39 = vpop.permute.xlu0 %1181 }
 0x17d   : > { %3493 = vrot.lane.b32.xlu1 %v6521_v18, %s5644_s15  ;;  %3489 = vrot.lane.b32.xlu0 %v6497_v12, %s5644_s15 }
 0x17f   : > { %v6638_v49 = vpop.permute.xlu1 %1896 }
 0x180   : > { %v1184_v42 = vpop.permute.xlu0 %1183 }
 0x181   : > { %v1196_v43 = vsel %vm1195_vm0, %v6600_v39, %v1184_v42  ;;  %1906 = vrot.lane.b32.xlu1 %v6565_v32, %s5640_s27  ;;  %3497 = vrot.lane.b32.xlu0 %v6543_v24, %s5644_s15  ;;  %s4873_s27 = sshll.u32 %s7387_s22, 1 }
 0x182   : > { %v1258_v44 = vmul.f32 %v1224_v41, %v1196_v43  ;;  %v1236_v41 = vrot.slane %v6594_v38, %v6744_v29 }
 0x183   : > { %v6650_v51 = vpop.permute.xlu1 %2304 }
 0x184   : > { %4877 = vmatprep.subr.msk.mxu0 %vm1271_vm1, %v1258_v44  ;;  %v6618_v45 = vpop.permute.xlu0 %1094 }
 0x185   : > { %3495 = vrot.lane.b32.xlu1 %v6523_v20, %s5644_s15  ;;  %3899 = vrot.lane.b32.xlu0 %v6499_v14, %s5645_s20 }
 0x188   : > { %v6624_v46 = vpop.permute.xlu0 %1894 }
 0x189   : > { %2314 = vrot.lane.b32.xlu1 %v6565_v32, %s5641_s13  ;;  %3897 = vrot.lane.b32.xlu0 %v6497_v12, %s5645_s20 }
 0x18c   : > { %v6632_v48 = vpop.permute.xlu0 %2302 }
 0x18d   : > { %3499 = vrot.lane.b32.xlu1 %v6545_v26, %s5644_s15  ;;  %3093 = vrot.lane.b32.xlu0 %v6565_v32, %s5642_s14 }
 0x190   : > { %v6640_v50 = vpop.permute.xlu0 %3083 }
 0x191   : > { %3901 = vrot.lane.b32.xlu1 %v6521_v18, %s5645_s20  ;;  %3905 = vrot.lane.b32.xlu0 %v6543_v24, %s5645_s20 }
 0x194   : > { %v6655_v53 = vpop.permute.xlu0 %3081 }
 0x195   : > { %3903 = vrot.lane.b32.xlu1 %v6523_v20, %s5645_s20  ;;  %3501 = vrot.lane.b32.xlu0 %v6565_v32, %s5644_s15 }
 0x199   : > { %3095 = vrot.lane.b32.xlu1 %v6567_v33, %s5642_s14  ;;  %4307 = vrot.lane.b32.xlu0 %v6499_v14, %s5646_s23 }
 0x19b   : > { %v1188_v59 = vpop.permute.xlu0 %1187 }
 0x19c   : > { %v1186_v57 = vpop.permute.xlu1 %1185 }
 0x19d   : > { %v1197_v58 = vsel %vm1195_vm0, %v1184_v42, %v1186_v57  ;;  %v1198_v61 = vsel %vm1195_vm0, %v1186_v57, %v1188_v59  ;;  %3907 = vrot.lane.b32.xlu1 %v6545_v26, %s5645_s20  ;;  %3909 = vrot.lane.b32.xlu0 %v6565_v32, %s5645_s20 }
 0x19e   : > { %v1259_v60 = vmul.f32 %v1228_v55, %v1197_v58  ;;  %v1260_v62 = vmul.f32 %v1232_v56, %v1198_v61  ;;  %v1136_v55 = vrot.slane %v6738_v25, %v6603_v40  ;;  %v1109_v58 = vsel %vm1108_vm3, %v6618_v45, %v6630_v47 }
 0x19f   : > { %v6705_v3 = vpop.permute.xlu0 %1100  ;;  %v6769_v61 = vor.u32 %v4902_v36, %v4901_v35  ;;  %v1152_v35 = vrot.slane %v6738_v25, %v6741_v28 }
 0x1a0   : > { %4880 = vmatprep.subr.msk.mxu1 %vm1271_vm1, %v1260_v62  ;;  %v6701_v2 = vpop.permute.xlu1 %1098 }
 0x1a1   : > { %4881 = vmatpush1.msk.msra.mxu1 %vm1271_vm1, %v1259_v60  ;;  %3503 = vrot.lane.b32.xlu1 %v6567_v33, %s5644_s15  ;;  %s262_s15 = scalar_lea.vmem %s7373_s6, %s4873_s27 }
 0x1a2   : > { %4305 = vrot.lane.b32.xlu0 %v6497_v12, %s5646_s23  ;;  %4882 = vmatmul.mubr.msk.f32.vlgmr.msra.gmra.mrb[8].mxu1 %vm1267_vm2, %v6683_v63 }
 0x1a3   : > { %1573 = vmatprep.mubr.f32.mxu1 %v7375_v27  ;;  %v6711_v5 = vpop.permute.xlu0 %1900 }
 0x1a4   : > { %v6707_v4 = vpop.permute.xlu1 %1898 }
 0x1a5   : > { %4309 = vrot.lane.b32.xlu1 %v6521_v18, %s5646_s23 }
 0x1a6   : > { %4313 = vrot.lane.b32.xlu0 %v6543_v24, %s5646_s23 }
 0x1a7   : > { %v6715_v7 = vpop.permute.xlu0 %2308 }
 0x1a8   : > { %v6713_v6 = vpop.permute.xlu1 %2306 }
 0x1a9   : > { %3911 = vrot.lane.b32.xlu1 %v6567_v33, %s5645_s20 }
 0x1aa   : > { %4317 = vrot.lane.b32.xlu0 %v6565_v32, %s5646_s23 }
 0x1ac   : > { %v6717_v8 = vpop.permute.xlu1 %3085 }
 0x1ad   : > { %4311 = vrot.lane.b32.xlu1 %v6523_v20, %s5646_s23 }
 0x1ae   : > { %4716 = vperm.xlu0 %5628, %v4713_v0   ;;  %v6772_v0 = vsub.s32 6, %v6592_v37  ;;  %v1111_v37 = vsel %vm1108_vm3, %v6701_v2, %v6705_v3 }
 0x1b1   : > { %4315 = vrot.lane.b32.xlu1 %v6545_v26, %s5646_s23 }
 0x1b5   : > { %4319 = vrot.lane.b32.xlu1 %v6567_v33, %s5646_s23 }
 0x1bb   : > { %v1192_v10 = vpop.permute.xlu0 %1191 }
 0x1bc   : > { %v1190_v9 = vpop.permute.xlu1 %1189 }
 0x1bd   : > { %v1200_v42 = vsel %vm1195_vm0, %v1190_v9, %v1192_v10  ;;  %v1199_v56 = vsel %vm1195_vm0, %v1188_v59, %v1190_v9  ;;  %v4916_v59 = vld [vmem:[%s7369_s2 + $0x3] ss:$8 sm:$0xf] }
 0x1be   : > { %v1262_v62 = vmul.f32 %v1240_v31, %v1200_v42  ;;  %v1261_v9 = vmul.f32 %v1236_v41, %v1199_v56  ;;  %v1170_v31 = vmul.f32 %v1136_v55, %v1109_v58  ;;  %v1244_v42 = vrot.slane %v6594_v38, %v6772_v0 }
 0x1bf   : > { %v6719_v13 = vpop.permute.xlu0 %1104  ;;  %v1248_v55 = vrot.slane %v6594_v38, %v6775_v1  ;;  %v1909_v58 = vsel %vm1908_vm4, %v6624_v46, %v6638_v49  ;;  %v1148_v38 = vrot.slane %v6738_v25, %v6744_v29 }
 0x1c0   : > { %v1103_v11 = vpop.permute.xlu1 %1102 }
 0x1c1   : > { %v1113_v41 = vsel %vm1108_vm3, %v1103_v11, %v6719_v13 }
 0x1c3   : > { %v6723_v15 = vpop.permute.xlu0 %1904 }
 0x1c4   : > { %v6721_v16 = vpop.permute.xlu1 %1902 }
 0x1c7   : > { %v6736_v23 = vpop.permute.xlu0 %2312 }
 0x1c8   : > { %v6734_v22 = vpop.permute.xlu1 %2310 }
 0x1db   : > { %v1179_v43 = vpop.permute.xlu1 %1178  ;;  %v6759_v44 = vpop.permute.xlu0 %1084 }
 0x1dc   : > { %v1211_v57 = vsel %vm1195_vm0, %v1179_v43, %v6600_v39  ;;  %v4917_v39 = vld [vmem:[%s7369_s2 + $0x3] ss:$8 sm:$0xf0]  ;;  %v1124_v36 = vsel %vm1108_vm3, %v6759_v44, %v6618_v45  ;;  %v1937_v45 = vrot.slane %v6769_v61, %v6603_v40 }
 0x1dd   : > { %v1257_v60 = vmul.f32 %v1220_v30, %v1211_v57  ;;  %v6808_v56 = vor.u32 %v4917_v39, %v4916_v59  ;;  %v1140_v57 = vrot.slane %v6738_v25, %v6653_v52  ;;  %v1112_v59 = vsel %vm1108_vm3, %v6705_v3, %v1103_v11  ;;  %v6836_v11 = vld [vmem:[%s7370_s3] sm:$0xff] }
 0x1de   : > { %v1174_v39 = vmul.f32 %v1152_v35, %v1113_v41  ;;  %v1173_v3 = vmul.f32 %v1148_v38, %v1112_v59  ;;  %v1933_v35 = vrot.slane %v6769_v61, %v6732_v21  ;;  %v4931_v59 = vld [vmem:[%s7369_s2 + $0x4] ss:$8 sm:$0xf] }
 0x1df   : > { %v6785_v19 = vpop.permute.xlu1 %3087  ;;  %4878 = vmatpush1.msk.msra.mxu0 %vm1271_vm1, %v1257_v60  ;;  %v6788_v30 = vpop.permute.xlu0 %3089  ;;  %v1144_v60 = vrot.slane %v6738_v25, %v6658_v54 }
 0x1e0   : > { %4879 = vmatmul.mubr.msk.f32.vlgmr.msra.gmra.mrb[8].mxu0 %vm1267_vm2, %v6683_v63  ;;  %4883 = vmatprep.subr.msk.mxu0 %vm1271_vm1, %v1262_v62  ;;  %v1169_v62 = vmul.f32 %v1132_v17, %v1124_v36  ;;  %v7382_v36 = vmov 0.0  }
 0x1e1   : > { %4884 = vmatpush1.msk.msra.mxu0 %vm1271_vm1, %v1261_v9  ;;  %1502 = vmatprep.mubr.f32.mxu0 %v7375_v27 }
 0x1e2   : > { %4889 = vmatprep.subr.msk.mxu0 %vm1271_vm1, %v1170_v31 }
 0x1e3   : > { %v1194_v9 = vpop.permute.xlu1 %1193  ;;  %v6820_v34 = vpop.permute.xlu0 %1891 }
 0x1e4   : > { %v1201_v31 = vsel %vm1195_vm0, %v1192_v10, %v1194_v9  ;;  %v1202_v27 = vsel %vm1195_vm0, %v1194_v9, %v1179_v43  ;;  %4885 = vmatmul.mubr.msk.f32.vlgmr.msra.gmra.mrb[10].mxu0 %vm1267_vm2, %v6683_v63  ;;  %v2345_v10 = vrot.slane %v6808_v56, %v6603_v40  ;;  %v1110_v43 = vsel %vm1108_vm3, %v6630_v47, %v6701_v2 }
 0x1e5   : > { %v1263_v32 = vmul.f32 %v1244_v42, %v1201_v31  ;;  %v1264_v17 = vmul.f32 %v1248_v55, %v1202_v27  ;;  %4890 = vmatpush1.msk.msra.mxu0 %vm1271_vm1, %v1169_v62  ;;  %1671 = vmatprep.mubr.f32.mxu0 %v7382_v36  ;;  %v1953_v27 = vrot.slane %v6769_v61, %v6741_v28 }
 0x1e6   : > { %4895 = vmatprep.subr.msk.mxu0 %vm1271_vm1, %v1174_v39  ;;  %v1156_v55 = vrot.slane %v6738_v25, %v6772_v0  ;;  %v1971_v62 = vmul.f32 %v1937_v45, %v1909_v58  ;;  %v1172_v47 = vmul.f32 %v1144_v60, %v1111_v37  ;;  %v1924_v2 = vsel %vm1908_vm4, %v6820_v34, %v6624_v46  ;;  %v4932_v39 = vld [vmem:[%s7369_s2 + $0x4] ss:$8 sm:$0xf0] }
 0x1e7   : > { %v6848_v41 = vpop.permute.xlu1 %3091  ;;  %4886 = vmatprep.subr.msk.mxu1 %vm1271_vm1, %v1264_v17  ;;  %v6851_v42 = vpop.permute.xlu0 %3491  ;;  %v1171_v38 = vmul.f32 %v1140_v57, %v1110_v43  ;;  %v1913_v9 = vsel %vm1908_vm4, %v6721_v16, %v6723_v15  ;;  %v1160_v37 = vrot.slane %v6738_v25, %v6775_v1  ;;  %v1941_v46 = vrot.slane %v6769_v61, %v6653_v52 }
 0x1e8   : > { %4887 = vmatpush1.msk.msra.mxu1 %vm1271_vm1, %v1263_v32  ;;  %4891 = vmatmul.mubr.msk.f32.vlgmr.msra.gmra.mrb[8].mxu0 %vm1267_vm2, %v6836_v11  ;;  %v1945_v32 = vrot.slane %v6769_v61, %v6658_v54  ;;  %v1949_v45 = vrot.slane %v6769_v61, %v6744_v29  ;;  %v1912_v25 = vsel %vm1908_vm4, %v6711_v5, %v6721_v16 }
 0x1e9   : > { %4896 = vmatpush1.msk.msra.mxu0 %vm1271_vm1, %v1173_v3  ;;  %4888 = vmatmul.mubr.msk.f32.vlgmr.msra.gmra.mrb[10].mxu1 %vm1267_vm2, %v6683_v63  ;;  %v2317_v63 = vsel %vm2316_vm5, %v6632_v48, %v6650_v51  ;;  %v1970_v57 = vmul.f32 %v1933_v35, %v1924_v2  ;;  %v1975_v31 = vmul.f32 %v1953_v27, %v1913_v9 }
 0x1ea   : > { %4892 = vmatprep.subr.msk.mxu1 %vm1271_vm1, %v1172_v47  ;;  %4904 = vmatprep.subr.msk.mxu0 %vm1271_vm1, %v1971_v62  ;;  %v1911_v43 = vsel %vm1908_vm4, %v6707_v4, %v6711_v5  ;;  %v2361_v27 = vrot.slane %v6808_v56, %v6741_v28  ;;  %v6918_v5 = vor.u32 %v4932_v39, %v4931_v59 }
 0x1eb   : > { %4893 = vmatpush1.msk.msra.mxu1 %vm1271_vm1, %v1171_v38  ;;  %v1107_v58 = vpop.permute.xlu1 %1106  ;;  %1813 = vmatprep.mubr.f32.mxu0 %v7382_v36  ;;  %v6885_v60 = vpop.permute.xlu0 %2299  ;;  %v2341_v62 = vrot.slane %v6808_v56, %v6732_v21  ;;  %v1973_v38 = vmul.f32 %v1945_v32, %v1911_v43  ;;  %v2353_v32 = vrot.slane %v6808_v56, %v6658_v54 }
 0x1ec   : > { %v1114_v16 = vsel %vm1108_vm3, %v6719_v13, %v1107_v58  ;;  %v1115_v17 = vsel %vm1108_vm3, %v1107_v58, %v6759_v44  ;;  %1742 = vmatprep.mubr.f32.mxu1 %v7382_v36  ;;  %4897 = vmatmul.mubr.msk.f32.vlgmr.msra.gmra.mrb[10].mxu0 %vm1267_vm2, %v6836_v11  ;;  %v6909_v13 = vld [vmem:[%s7370_s3 + $0x10] sm:$0xff]  ;;  %v1910_v44 = vsel %vm1908_vm4, %v6638_v49, %v6707_v4 }
 0x1ed   : > { %v1175_v3 = vmul.f32 %v1156_v55, %v1114_v16  ;;  %v1176_v35 = vmul.f32 %v1160_v37, %v1115_v17  ;;  %4905 = vmatpush1.msk.msra.mxu0 %vm1271_vm1, %v1970_v57  ;;  %4894 = vmatmul.mubr.msk.f32.vlgmr.msra.gmra.mrb[8].mxu1 %vm1267_vm2, %v6836_v11  ;;  %v1974_v55 = vmul.f32 %v1949_v45, %v1912_v25  ;;  %v4946_v58 = vld [vmem:[%s7369_s2 + $0x5] ss:$8 sm:$0xf] }
 0x1ee   : > { %4910 = vmatprep.subr.msk.mxu0 %vm1271_vm1, %v1975_v31  ;;  %2071 = vmatprep.mubr.f32.mxu0 %v7382_v36  ;;  %v1957_v49 = vrot.slane %v6769_v61, %v6772_v0  ;;  %v2379_v4 = vmul.f32 %v2345_v10, %v2317_v63  ;;  %v2332_v9 = vsel %vm2316_vm5, %v6885_v60, %v6632_v48 }
 0x1ef   : > { %v6922_v47 = vpop.permute.xlu1 %3493  ;;  %4898 = vmatprep.subr.msk.mxu1 %vm1271_vm1, %v1176_v35  ;;  %v6925_v2 = vpop.permute.xlu0 %3489  ;;  %1884 = vmatprep.mubr.f32.mxu1 %v7382_v36  ;;  %v1972_v37 = vmul.f32 %v1941_v46, %v1910_v44  ;;  %v2321_v45 = vsel %vm2316_vm5, %v6734_v22, %v6736_v23  ;;  %v1961_v10 = vrot.slane %v6769_v61, %v6775_v1 }
 0x1f0   : > { %4899 = vmatpush1.msk.msra.mxu1 %vm1271_vm1, %v1175_v3  ;;  %4906 = vmatmul.mubr.msk.f32.vlgmr.msra.gmra.mrb[8].mxu0 %vm1267_vm2, %v6909_v13  ;;  %v2349_v48 = vrot.slane %v6808_v56, %v6653_v52  ;;  %v2719_v46 = vrot.slane %v6918_v5, %v6603_v40  ;;  %v2357_v63 = vrot.slane %v6808_v56, %v6744_v29 }
 0x1f1   : > { %4911 = vmatpush1.msk.msra.mxu0 %vm1271_vm1, %v1974_v55  ;;  %4900 = vmatmul.mubr.msk.f32.vlgmr.msra.gmra.mrb[10].mxu1 %vm1267_vm2, %v6836_v11  ;;  %v2320_v61 = vsel %vm2316_vm5, %v6715_v7, %v6734_v22  ;;  %v2378_v11 = vmul.f32 %v2341_v62, %v2332_v9  ;;  %v2383_v59 = vmul.f32 %v2361_v27, %v2321_v45  ;;  %v4947_v22 = vld [vmem:[%s7369_s2 + $0x5] ss:$8 sm:$0xf0] }
 0x1f2   : > { %4907 = vmatprep.subr.msk.mxu1 %vm1271_vm1, %v1973_v38  ;;  %4919 = vmatprep.subr.msk.mxu0 %vm1271_vm1, %v2379_v4  ;;  %v2319_v16 = vsel %vm2316_vm5, %v6713_v6, %v6715_v7  ;;  %v2382_v7 = vmul.f32 %v2357_v63, %v2320_v61  ;;  %v2715_v44 = vrot.slane %v6918_v5, %v6732_v21  ;;  %v4962_v63 = vld [vmem:[%s7369_s2 + $0x6] ss:$8 sm:$0xf0] }
 0x1f3   : > { %4908 = vmatpush1.msk.msra.mxu1 %vm1271_vm1, %v1972_v37  ;;  %v1907_v25 = vpop.permute.xlu1 %1906  ;;  %2213 = vmatprep.mubr.f32.mxu0 %v7382_v36  ;;  %v6959_v57 = vpop.permute.xlu0 %3497  ;;  %v2735_v27 = vrot.slane %v6918_v5, %v6741_v28  ;;  %v2753_v55 = vmul.f32 %v6499_v14, %v2719_v46  ;;  %v2369_v4 = vrot.slane %v6808_v56, %v6775_v1 }
 0x1f4   : > { %v1914_v39 = vsel %vm1908_vm4, %v6723_v15, %v1907_v25  ;;  %v1915_v31 = vsel %vm1908_vm4, %v1907_v25, %v6820_v34  ;;  %2142 = vmatprep.mubr.f32.mxu1 %v7382_v36  ;;  %4912 = vmatmul.mubr.msk.f32.vlgmr.msra.gmra.mrb[10].mxu0 %vm1267_vm2, %v6909_v13  ;;  %v6983_v34 = vld [vmem:[%s7370_s3 + $0x18] sm:$0xff]  ;;  %v2318_v15 = vsel %vm2316_vm5, %v6650_v51, %v6713_v6 }
 0x1f5   : > { %v1976_v17 = vmul.f32 %v1957_v49, %v1914_v39  ;;  %v1977_v43 = vmul.f32 %v1961_v10, %v1915_v31  ;;  %4920 = vmatpush1.msk.msra.mxu0 %vm1271_vm1, %v2378_v11  ;;  %4909 = vmatmul.mubr.msk.f32.vlgmr.msra.gmra.mrb[8].mxu1 %vm1267_vm2, %v6909_v13  ;;  %v7000_v51 = vor.u32 %v4947_v22, %v4946_v58  ;;  %v4961_v10 = vld [vmem:[%s7369_s2 + $0x6] ss:$8 sm:$0xf] }
 0x1f6   : > { %4925 = vmatprep.subr.msk.mxu0 %vm1271_vm1, %v2383_v59  ;;  %2479 = vmatprep.mubr.f32.mxu0 %v7382_v36  ;;  %v2381_v6 = vmul.f32 %v2353_v32, %v2319_v16  ;;  %v2380_v62 = vmul.f32 %v2349_v48, %v2318_v15  ;;  %v2365_v49 = vrot.slane %v6808_v56, %v6772_v0 }
 0x1f7   : > { %v6990_v3 = vpop.permute.xlu1 %3495  ;;  %4913 = vmatprep.subr.msk.mxu1 %vm1271_vm1, %v1977_v43  ;;  %v6993_v35 = vpop.permute.xlu0 %3899  ;;  %2284 = vmatprep.mubr.f32.mxu1 %v7382_v36  ;;  %v2727_v38 = vrot.slane %v6918_v5, %v6658_v54  ;;  %v2723_v14 = vrot.slane %v6918_v5, %v6653_v52  ;;  %v3127_v9 = vrot.slane %v7000_v51, %v6603_v40 }
 0x1f8   : > { %4914 = vmatpush1.msk.msra.mxu1 %vm1271_vm1, %v1976_v17  ;;  %4921 = vmatmul.mubr.msk.f32.vlgmr.msra.gmra.mrb[8].mxu0 %vm1267_vm2, %v6983_v34  ;;  %v2752_v56 = vmul.f32 %v6497_v12, %v2715_v44  ;;  %v2731_v45 = vrot.slane %v6918_v5, %v6744_v29  ;;  %v2757_v12 = vmul.f32 %v6545_v26, %v2735_v27  ;;  %v4977_v44 = vld [vmem:[%s7369_s2 + $0x7] ss:$8 sm:$0xf0] }
 0x1f9   : > { %4926 = vmatpush1.msk.msra.mxu0 %vm1271_vm1, %v2382_v7  ;;  %4915 = vmatmul.mubr.msk.f32.vlgmr.msra.gmra.mrb[10].mxu1 %vm1267_vm2, %v6909_v13  ;;  %v3099_v46 = vsel %vm3097_vm6, %v6640_v50, %v6717_v8  ;;  %v2743_v26 = vrot.slane %v6918_v5, %v6775_v1  ;;  %v2739_v11 = vrot.slane %v6918_v5, %v6772_v0  ;;  %v4976_v7 = vld [vmem:[%s7369_s2 + $0x7] ss:$8 sm:$0xf] }
 0x1fa   : > { %4922 = vmatprep.subr.msk.mxu1 %vm1271_vm1, %v2381_v6  ;;  %4934 = vmatprep.subr.msk.mxu0 %vm1271_vm1, %v2753_v55  ;;  %v3123_v25 = vrot.slane %v7000_v51, %v6732_v21  ;;  %v2756_v39 = vmul.f32 %v6543_v24, %v2731_v45  ;;  %v2754_v31 = vmul.f32 %v6521_v18, %v2723_v14 }
 0x1fb   : > { %4923 = vmatpush1.msk.msra.mxu1 %vm1271_vm1, %v2380_v62  ;;  %v2315_v13 = vpop.permute.xlu1 %2314  ;;  %2621 = vmatprep.mubr.f32.mxu0 %v7382_v36  ;;  %v7023_v37 = vpop.permute.xlu0 %3897  ;;  %v3161_v22 = vmul.f32 %v3127_v9, %v3099_v46  ;;  %v7069_v16 = vor.u32 %v4962_v63, %v4961_v10  ;;  %v2755_v5 = vmul.f32 %v6523_v20, %v2727_v38 }
 0x1fc   : > { %v2322_v48 = vsel %vm2316_vm5, %v6736_v23, %v2315_v13  ;;  %v2323_v32 = vsel %vm2316_vm5, %v2315_v13, %v6885_v60  ;;  %2550 = vmatprep.mubr.f32.mxu1 %v7382_v36  ;;  %4927 = vmatmul.mubr.msk.f32.vlgmr.msra.gmra.mrb[10].mxu0 %vm1267_vm2, %v6983_v34  ;;  %v7051_v60 = vld [vmem:[%s7370_s3 + $0x20] sm:$0xff]  ;;  %v3098_v17 = vsel %vm3097_vm6, %v6655_v53, %v6640_v50 }
 0x1fd   : > { %v2384_v61 = vmul.f32 %v2365_v49, %v2322_v48  ;;  %v2385_v23 = vmul.f32 %v2369_v4, %v2323_v32  ;;  %4935 = vmatpush1.msk.msra.mxu0 %vm1271_vm1, %v2752_v56  ;;  %4924 = vmatmul.mubr.msk.f32.vlgmr.msra.gmra.mrb[8].mxu1 %vm1267_vm2, %v6983_v34  ;;  %v3135_v43 = vrot.slane %v7000_v51, %v6658_v54 }
 0x1fe   : > { %4940 = vmatprep.subr.msk.mxu0 %vm1271_vm1, %v2757_v12  ;;  %2853 = vmatprep.mubr.f32.mxu0 %v7382_v36  ;;  %v3143_v18 = vrot.slane %v7000_v51, %v6741_v28  ;;  %v3101_v24 = vsel %vm3097_vm6, %v6785_v19, %v6788_v30  ;;  %v2759_v50 = vmul.f32 %v6567_v33, %v2743_v26  ;;  %v7383_v33 = vld [vmem:[#allocation2_spill] sm:$0xff] }
 0x1ff   : > { %v7061_v58 = vpop.permute.xlu1 %3499  ;;  %4928 = vmatprep.subr.msk.mxu1 %vm1271_vm1, %v2385_v23  ;;  %v7064_v59 = vpop.permute.xlu0 %3093  ;;  %2692 = vmatprep.mubr.f32.mxu1 %v7382_v36  ;;  %v3131_v15 = vrot.slane %v7000_v51, %v6653_v52  ;;  %v2758_v55 = vmul.f32 %v7383_v33, %v2739_v11  ;;  %v3160_v62 = vmul.f32 %v3123_v25, %v3098_v17 }
 0x200   : > { %4929 = vmatpush1.msk.msra.mxu1 %vm1271_vm1, %v2384_v61  ;;  %4936 = vmatmul.mubr.msk.f32.vlgmr.msra.gmra.mrb[8].mxu0 %vm1267_vm2, %v7051_v60  ;;  %v3103_v20 = vsel %vm3097_vm6, %v6848_v41, %v7064_v59  ;;  %v3100_v49 = vsel %vm3097_vm6, %v6717_v8, %v6785_v19  ;;  %v3535_v4 = vrot.slane %v7069_v16, %v6603_v40 }
 0x201   : > { %4941 = vmatpush1.msk.msra.mxu0 %vm1271_vm1, %v2756_v39  ;;  %4930 = vmatmul.mubr.msk.f32.vlgmr.msra.gmra.mrb[10].mxu1 %vm1267_vm2, %v6983_v34  ;;  %v3139_v34 = vrot.slane %v7000_v51, %v6744_v29  ;;  %v3163_v38 = vmul.f32 %v3135_v43, %v3101_v24  ;;  %v3102_v14 = vsel %vm3097_vm6, %v6788_v30, %v6848_v41  ;;  %v7135_v30 = vld [vmem:[%s7370_s3 + $0x28] sm:$0xff] }
 0x202   : > { %4937 = vmatprep.subr.msk.mxu1 %vm1271_vm1, %v2755_v5  ;;  %4949 = vmatprep.subr.msk.mxu0 %vm1271_vm1, %v3161_v22  ;;  %v3165_v9 = vmul.f32 %v3143_v18, %v3103_v20  ;;  %v3507_v8 = vsel %vm3505_vm7, %v6851_v42, %v6922_v47  ;;  %v7128_v19 = vor.u32 %v4977_v44, %v4976_v7  ;;  %v4991_v20 = vld [vmem:[%s7369_s2 + $0x40] ss:$8 sm:$0xf] }
 0x203   : > { %4938 = vmatpush1.msk.msra.mxu1 %vm1271_vm1, %v2754_v31  ;;  %v7105_v27 = vpop.permute.xlu1 %3901  ;;  %v7107_v6 = vpop.permute.xlu0 %3905  ;;  %2995 = vmatprep.mubr.f32.mxu0 %v7382_v36  ;;  %v3531_v41 = vrot.slane %v7069_v16, %v6732_v21  ;;  %v3539_v13 = vrot.slane %v7069_v16, %v6653_v52  ;;  %v3551_v45 = vrot.slane %v7069_v16, %v6741_v28 }
 0x204   : > { %4943 = vmatprep.subr.msk.mxu1 %vm1271_vm1, %v2759_v50  ;;  %2924 = vmatprep.mubr.f32.mxu1 %v7382_v36  ;;  %v3162_v48 = vmul.f32 %v3131_v15, %v3100_v49  ;;  %v3164_v32 = vmul.f32 %v3139_v34, %v3102_v14  ;;  %v3506_v12 = vsel %vm3505_vm7, %v6925_v2, %v6851_v42  ;;  %v4992_v50 = vld [vmem:[%s7369_s2 + $0x40] ss:$8 sm:$0xf0] }
 0x205   : > { %4942 = vmatmul.mubr.msk.f32.vlgmr.msra.gmra.mrb[10].mxu0 %vm1267_vm2, %v7051_v60  ;;  %4939 = vmatmul.mubr.msk.f32.vlgmr.msra.gmra.mrb[8].mxu1 %vm1267_vm2, %v7051_v60  ;;  %v3569_v46 = vmul.f32 %v3535_v4, %v3507_v8  ;;  %v3147_v63 = vrot.slane %v7000_v51, %v6772_v0  ;;  %v3151_v61 = vrot.slane %v7000_v51, %v6775_v1 }
 0x206   : > { %4950 = vmatpush1.msk.msra.mxu0 %vm1271_vm1, %v3160_v62  ;;  %4944 = vmatpush1.msk.msra.mxu1 %vm1271_vm1, %v2758_v55  ;;  %v3543_v42 = vrot.slane %v7069_v16, %v6658_v54  ;;  %v3939_v23 = vrot.slane %v7128_v19, %v6732_v21  ;;  %v3547_v11 = vrot.slane %v7069_v16, %v6744_v29 }
 0x207   : > { %4955 = vmatprep.subr.msk.mxu0 %vm1271_vm1, %v3165_v9  ;;  %4952 = vmatprep.subr.msk.mxu1 %vm1271_vm1, %v3163_v38  ;;  %v7143_v56 = vpop.permute.xlu1 %3903  ;;  %v7147_v10 = vpop.permute.xlu0 %3501  ;;  %v3943_v51 = vrot.slane %v7128_v19, %v6603_v40  ;;  %v3509_v31 = vsel %vm3505_vm7, %v6990_v3, %v6959_v57  ;;  %v3510_v22 = vsel %vm3505_vm7, %v6959_v57, %v7061_v58  ;;  %v7197_v57 = vld [vmem:[%s7370_s3 + $0x30] sm:$0xff] }
 0x208   : > { %3261 = vmatprep.mubr.f32.mxu0 %v7382_v36  ;;  %3066 = vmatprep.mubr.f32.mxu1 %v7382_v36  ;;  %v3511_v26 = vsel %vm3505_vm7, %v7061_v58, %v7147_v10  ;;  %v3915_v58 = vsel %vm3913_vm8, %v6993_v35, %v7105_v27  ;;  %v3555_v34 = vrot.slane %v7069_v16, %v6772_v0 }
 0x209   : > { %4951 = vmatmul.mubr.msk.f32.vlgmr.msra.gmra.mrb[8].mxu0 %vm1267_vm2, %v7135_v30  ;;  %4945 = vmatmul.mubr.msk.f32.vlgmr.msra.gmra.mrb[10].mxu1 %vm1267_vm2, %v7051_v60  ;;  %v3568_v60 = vmul.f32 %v3531_v41, %v3506_v12  ;;  %v3573_v43 = vmul.f32 %v3551_v45, %v3511_v26  ;;  %v3559_v7 = vrot.slane %v7069_v16, %v6775_v1 }
 0x20a   : > { %4956 = vmatpush1.msk.msra.mxu0 %vm1271_vm1, %v3164_v32  ;;  %4953 = vmatpush1.msk.msra.mxu1 %vm1271_vm1, %v3162_v48  ;;  %v3571_v44 = vmul.f32 %v3543_v42, %v3509_v31  ;;  %v3914_v33 = vsel %vm3913_vm8, %v7023_v37, %v6993_v35  ;;  %v3572_v55 = vmul.f32 %v3547_v11, %v3510_v22 }
 0x20b   : > { %4964 = vmatprep.subr.msk.mxu0 %vm1271_vm1, %v3569_v46  ;;  %v3096_v25 = vpop.permute.xlu1 %3095  ;;  %v7176_v39 = vpop.permute.xlu0 %4307  ;;  %3403 = vmatprep.mubr.f32.mxu0 %v7382_v36  ;;  %v3977_v49 = vmul.f32 %v3943_v51, %v3915_v58  ;;  %v7234_v4 = vor.u32 %v4992_v50, %v4991_v20  ;;  %v3951_v16 = vrot.slane %v7128_v19, %v6658_v54 }
 0x20c   : > { %v3104_v5 = vsel %vm3097_vm6, %v7064_v59, %v3096_v25  ;;  %v3114_v17 = vsel %vm3097_vm6, %v3096_v25, %v6655_v53  ;;  %3332 = vmatprep.mubr.f32.mxu1 %v7382_v36  ;;  %v3508_v53 = vsel %vm3505_vm7, %v6922_v47, %v6990_v3  ;;  %v3947_v59 = vrot.slane %v7128_v19, %v6653_v52 }
 0x20d   : > { %v3166_v18 = vmul.f32 %v3147_v63, %v3104_v5  ;;  %v3167_v24 = vmul.f32 %v3151_v61, %v3114_v17  ;;  %4957 = vmatmul.mubr.msk.f32.vlgmr.msra.gmra.mrb[10].mxu0 %vm1267_vm2, %v7135_v30  ;;  %4954 = vmatmul.mubr.msk.f32.vlgmr.msra.gmra.mrb[8].mxu1 %vm1267_vm2, %v7135_v30  ;;  %v3959_v3 = vrot.slane %v7128_v19, %v6741_v28 }
 0x20e   : > { %4965 = vmatpush1.msk.msra.mxu0 %vm1271_vm1, %v3568_v60  ;;  %3669 = vmatprep.mubr.f32.mxu0 %v7382_v36  ;;  %v3570_v62 = vmul.f32 %v3539_v13, %v3508_v53  ;;  %v3955_v35 = vrot.slane %v7128_v19, %v6744_v29  ;;  %v3976_v14 = vmul.f32 %v3939_v23, %v3914_v33 }
 0x20f   : > { %4970 = vmatprep.subr.msk.mxu0 %vm1271_vm1, %v3573_v43  ;;  %v3908_v47 = vpop.permute.xlu1 %3907  ;;  %4958 = vmatprep.subr.msk.mxu1 %vm1271_vm1, %v3167_v24  ;;  %v7219_v15 = vpop.permute.xlu0 %3909  ;;  %v3917_v9 = vsel %vm3913_vm8, %v7143_v56, %v7107_v6  ;;  %v4355_v60 = vrot.slane %v7234_v4, %v6653_v52  ;;  %v4359_v52 = vrot.slane %v7234_v4, %v6658_v54 }
 0x210   : > { %4959 = vmatpush1.msk.msra.mxu1 %vm1271_vm1, %v3166_v18  ;;  %3474 = vmatprep.mubr.f32.mxu1 %v7382_v36  ;;  %v3919_v38 = vsel %vm3913_vm8, %v3908_v47, %v7219_v15  ;;  %v3918_v41 = vsel %vm3913_vm8, %v7107_v6, %v3908_v47  ;;  %v3979_v63 = vmul.f32 %v3951_v16, %v3917_v9 }
 0x211   : > { %4966 = vmatmul.mubr.msk.f32.vlgmr.msra.gmra.mrb[8].mxu0 %vm1267_vm2, %v7197_v57  ;;  %4960 = vmatmul.mubr.msk.f32.vlgmr.msra.gmra.mrb[10].mxu1 %vm1267_vm2, %v7135_v30  ;;  %v4351_v30 = vrot.slane %v7234_v4, %v6603_v40  ;;  %v3981_v48 = vmul.f32 %v3959_v3, %v3919_v38  ;;  %v3916_v40 = vsel %vm3913_vm8, %v7105_v27, %v7143_v56 }
 0x212   : > { %4971 = vmatpush1.msk.msra.mxu0 %vm1271_vm1, %v3572_v55  ;;  %4967 = vmatprep.subr.msk.mxu1 %vm1271_vm1, %v3571_v44  ;;  %v3963_v27 = vrot.slane %v7128_v19, %v6772_v0  ;;  %v3967_v56 = vrot.slane %v7128_v19, %v6775_v1  ;;  %v3980_v61 = vmul.f32 %v3955_v35, %v3918_v41 }
 0x213   : > { %4979 = vmatprep.subr.msk.mxu0 %vm1271_vm1, %v3977_v49  ;;  %4968 = vmatpush1.msk.msra.mxu1 %vm1271_vm1, %v3570_v62  ;;  %v3504_v8 = vpop.permute.xlu1 %3503  ;;  %v4363_v54 = vrot.slane %v7234_v4, %v6744_v29  ;;  %v4375_v47 = vrot.slane %v7234_v4, %v6775_v1 }
 0x214   : > { %v3512_v13 = vsel %vm3505_vm7, %v7147_v10, %v3504_v8  ;;  %v3522_v45 = vsel %vm3505_vm7, %v3504_v8, %v6925_v2  ;;  %3811 = vmatprep.mubr.f32.mxu0 %v7382_v36  ;;  %3740 = vmatprep.mubr.f32.mxu1 %v7382_v36  ;;  %v7266_v6 = vpop.permute.xlu0 %4305  ;;  %v4978_v2 = vld [vmem:[%s7370_s3 + $0x38] sm:$0xff]  ;;  %v4347_v10 = vrot.slane %v7234_v4, %v6732_v21 }
 0x215   : > { %v3574_v32 = vmul.f32 %v3555_v34, %v3512_v13  ;;  %v3575_v12 = vmul.f32 %v3559_v7, %v3522_v45  ;;  %4972 = vmatmul.mubr.msk.f32.vlgmr.msra.gmra.mrb[10].mxu0 %vm1267_vm2, %v7197_v57  ;;  %4969 = vmatmul.mubr.msk.f32.vlgmr.msra.gmra.mrb[8].mxu1 %vm1267_vm2, %v7197_v57  ;;  %v3978_v21 = vmul.f32 %v3947_v59, %v3916_v40 }
 0x216   : > { %4980 = vmatpush1.msk.msra.mxu0 %vm1271_vm1, %v3976_v14  ;;  %4077 = vmatprep.mubr.f32.mxu0 %v7382_v36  ;;  %v4322_v23 = vsel %vm4321_vm9, %v7266_v6, %v7176_v39 }
 0x217   : > { %4985 = vmatprep.subr.msk.mxu0 %vm1271_vm1, %v3981_v48  ;;  %v4310_v46 = vpop.permute.xlu1 %4309  ;;  %4973 = vmatprep.subr.msk.mxu1 %vm1271_vm1, %v3575_v12  ;;  %v4384_v11 = vmul.f32 %v4347_v10, %v4322_v23 }
 0x218   : > { %v4323_v42 = vsel %vm4321_vm9, %v7176_v39, %v4310_v46  ;;  %4974 = vmatpush1.msk.msra.mxu1 %vm1271_vm1, %v3574_v32  ;;  %3882 = vmatprep.mubr.f32.mxu1 %v7382_v36  ;;  %v4314_v39 = vpop.permute.xlu0 %4313 }
 0x219   : > { %v4385_v26 = vmul.f32 %v4351_v30, %v4323_v42  ;;  %4981 = vmatmul.mubr.msk.f32.vlgmr.msra.gmra.mrb[8].mxu0 %vm1267_vm2, %v4978_v2  ;;  %4975 = vmatmul.mubr.msk.f32.vlgmr.msra.gmra.mrb[10].mxu1 %vm1267_vm2, %v7197_v57  ;;  %v4367_v57 = vrot.slane %v7234_v4, %v6741_v28  ;;  %v4371_v28 = vrot.slane %v7234_v4, %v6772_v0 }
 0x21a   : > { %4986 = vmatpush1.msk.msra.mxu0 %vm1271_vm1, %v3980_v61  ;;  %4982 = vmatprep.subr.msk.mxu1 %vm1271_vm1, %v3979_v63 }
 0x21b   : > { %4983 = vmatpush1.msk.msra.mxu1 %vm1271_vm1, %v3978_v21  ;;  %v3912_v19 = vpop.permute.xlu1 %3911  ;;  %4219 = vmatprep.mubr.f32.mxu0 %v7382_v36 }
 0x21c   : > { %v3920_v51 = vsel %vm3913_vm8, %v7219_v15, %v3912_v19  ;;  %v3930_v25 = vsel %vm3913_vm8, %v3912_v19, %v7023_v37  ;;  %4994 = vmatprep.subr.msk.mxu0 %vm1271_vm1, %v4385_v26  ;;  %4148 = vmatprep.mubr.f32.mxu1 %v7382_v36  ;;  %v4993_v37 = vld [vmem:[%s7370_s3 + $0x40] sm:$0xff]  ;;  %v4318_v53 = vpop.permute.xlu0 %4317 }
 0x21d   : > { %v3982_v31 = vmul.f32 %v3963_v27, %v3920_v51  ;;  %v3983_v22 = vmul.f32 %v3967_v56, %v3930_v25  ;;  %4987 = vmatmul.mubr.msk.f32.vlgmr.msra.gmra.mrb[10].mxu0 %vm1267_vm2, %v4978_v2  ;;  %4984 = vmatmul.mubr.msk.f32.vlgmr.msra.gmra.mrb[8].mxu1 %vm1267_vm2, %v4978_v2 }
 0x21e   : > { %4995 = vmatpush1.msk.msra.mxu0 %vm1271_vm1, %v4384_v11  ;;  %4485 = vmatprep.mubr.f32.mxu0 %v7382_v36 }
 0x21f   : > { %v4312_v5 = vpop.permute.xlu1 %4311  ;;  %4988 = vmatprep.subr.msk.mxu1 %vm1271_vm1, %v3983_v22  ;;  %4290 = vmatprep.mubr.f32.mxu1 %v7382_v36  ;;  %v7385_v22 = vld [vmem:[#allocation3_spill] sm:$0xff] }
 0x220   : > { %v4324_v17 = vsel %vm4321_vm9, %v4310_v46, %v4312_v5  ;;  %v4325_v43 = vsel %vm4321_vm9, %v4312_v5, %v4314_v39  ;;  %4989 = vmatpush1.msk.msra.mxu1 %vm1271_vm1, %v3982_v31 }
 0x221   : > { %v4386_v18 = vmul.f32 %v4355_v60, %v4324_v17  ;;  %v4387_v24 = vmul.f32 %v4359_v52, %v4325_v43  ;;  %4996 = vmatmul.mubr.msk.f32.vlgmr.msra.gmra.mrb[8].mxu0 %vm1267_vm2, %v4993_v37  ;;  %4990 = vmatmul.mubr.msk.f32.vlgmr.msra.gmra.mrb[10].mxu1 %vm1267_vm2, %v4978_v2 }
 0x222   : > { %4556 = vmatprep.mubr.f32.mxu1 %v7382_v36  ;;  %4627 = vmatprep.mubr.f32.mxu0 %v7382_v36 }
 0x223   : > { %v4316_v58 = vpop.permute.xlu1 %4315  ;;  %4997 = vmatprep.subr.msk.mxu1 %vm1271_vm1, %v4387_v24 }
 0x224   : > { %v4326_v59 = vsel %vm4321_vm9, %v4314_v39, %v4316_v58  ;;  %v4327_v29 = vsel %vm4321_vm9, %v4316_v58, %v4318_v53  ;;  %4998 = vmatpush1.msk.msra.mxu1 %vm1271_vm1, %v4386_v18  ;;  %v7384_v39 = vlaneseq }
 0x225   : > { %v4388_v20 = vmul.f32 %v4363_v54, %v4326_v59  ;;  %v4389_v50 = vmul.f32 %v4367_v57, %v4327_v29  ;;  %4999 = vmatmul.mubr.msk.f32.vlgmr.msra.gmra.mrb[8].mxu1 %vm1267_vm2, %v4993_v37 }
 0x226   : > { %4698 = vmatprep.mubr.f32.mxu1 %v7382_v36  ;;  %v4746_v31 = vand.u32 127, %v7384_v39 }
 0x227   : > { %v4320_v3 = vpop.permute.xlu1 %4319  ;;  %5000 = vmatprep.subr.msk.mxu0 %vm1271_vm1, %v4389_v50 }
 0x228   : > { %v4328_v15 = vsel %vm4321_vm9, %v4318_v53, %v4320_v3  ;;  %v4338_v34 = vsel %vm4321_vm9, %v4320_v3, %v7266_v6  ;;  %5001 = vmatpush1.msk.msra.mxu0 %vm1271_vm1, %v4388_v20  ;;  %v4749_v52 = vsub.s32 %v4746_v31, %v7385_v22 }
 0x229   : > { %v4390_v7 = vmul.f32 %v4371_v28, %v4328_v15  ;;  %v4391_v44 = vmul.f32 %v4375_v47, %v4338_v34  ;;  %5002 = vmatmul.mubr.msk.f32.vlgmr.msra.gmra.mrb[10].mxu0 %vm1267_vm2, %v4993_v37 }
 0x22b   : > { %5003 = vmatprep.subr.msk.mxu1 %vm1271_vm1, %v4391_v44 }
 0x22c   : > { %5004 = vmatpush1.msk.msra.mxu1 %vm1271_vm1, %v4390_v7 }
 0x22d   : > { %5005 = vmatmul.mubr.msk.f32.vlgmr.msra.gmra.mrb[10].mxu1 %vm1267_vm2, %v4993_v37  ;;  %v4717_v0 = vpop.permute.xlu0 %4716 }
 0x2f4   : > { %v4487_v1 = vpop.f32.mrb[8].mxu0 }
 0x2f5   : > { %v4719_v36 = vadd.f32 %v4717_v0, %v4487_v1  ;;  %v4489_v33 = vpop.f32.mrb[9].mxu0 }
 0x2f6   : > { %v4720_v55 = vadd.f32 %v4717_v0, %v4489_v33 }
 0x2f7   : > { %4727 = vst [vmem:[%s7348_s12] sm:$0xff] %v4719_v36  ;;  %v4754_v62 = vmul.f32 %v4719_v36, %v4719_v36 }
 0x2f8   : > { %4728 = vst [vmem:[%s7348_s12 + $0x8] sm:$0xff] %v4720_v55  ;;  %v4735_v49 = vadd.f32 %v4720_v55, %v4719_v36  ;;  %v4755_v4 = vmul.f32 %v4720_v55, %v4720_v55  ;;  %v4558_v16 = vpop.f32.mrb[8].mxu1 }
 0x2f9   : > { %v4721_v35 = vadd.f32 %v4717_v0, %v4558_v16  ;;  %v4560_v38 = vpop.f32.mrb[9].mxu1 }
 0x2fa   : > { %v4762_v14 = vadd.f32 %v4755_v4, %v4754_v62  ;;  %v4722_v9 = vadd.f32 %v4717_v0, %v4560_v38 }
 0x2fb   : > { %4729 = vst [vmem:[%s7348_s12 + $0x10] sm:$0xff] %v4721_v35  ;;  %v4736_v8 = vadd.f32 %v4735_v49, %v4721_v35  ;;  %v4756_v30 = vmul.f32 %v4721_v35, %v4721_v35 }
 0x2fc   : > { %4730 = vst [vmem:[%s7348_s12 + $0x18] sm:$0xff] %v4722_v9  ;;  %v4757_v41 = vmul.f32 %v4722_v9, %v4722_v9  ;;  %v4629_v13 = vpop.f32.mrb[10].mxu0 }
 0x2fd   : > { %v4763_v45 = vadd.f32 %v4762_v14, %v4756_v30  ;;  %v4737_v48 = vadd.f32 %v4736_v8, %v4722_v9  ;;  %v4723_v32 = vadd.f32 %v4717_v0, %v4629_v13  ;;  %v4631_v12 = vpop.f32.mrb[11].mxu0 }
 0x2fe   : > { %v4724_v40 = vadd.f32 %v4717_v0, %v4631_v12 }
 0x2ff   : > { %v4764_v6 = vadd.f32 %v4763_v45, %v4757_v41  ;;  %4731 = vst [vmem:[%s7348_s12 + $0x20] sm:$0xff] %v4723_v32  ;;  %v4738_v2 = vadd.f32 %v4737_v48, %v4723_v32  ;;  %v4758_v10 = vmul.f32 %v4723_v32, %v4723_v32 }
 0x300   : > { %4732 = vst [vmem:[%s7348_s12 + $0x28] sm:$0xff] %v4724_v40  ;;  %v4759_v46 = vmul.f32 %v4724_v40, %v4724_v40  ;;  %v4700_v27 = vpop.f32.mrb[10].mxu1 }
 0x301   : > { %v4765_v56 = vadd.f32 %v4764_v6, %v4758_v10  ;;  %v4739_v63 = vadd.f32 %v4738_v2, %v4724_v40  ;;  %v4725_v61 = vadd.f32 %v4717_v0, %v4700_v27  ;;  %v4702_v42 = vpop.f32.mrb[11].mxu1 }
 0x302   : > { %v4726_v21 = vadd.f32 %v4717_v0, %v4702_v42 }
 0x303   : > { %4733 = vst [vmem:[%s7348_s12 + $0x30] sm:$0xff] %v4725_v61  ;;  %v4760_v23 = vmul.f32 %v4725_v61, %v4725_v61  ;;  %v4740_v26 = vadd.f32 %v4739_v63, %v4725_v61  ;;  %v4766_v19 = vadd.f32 %v4765_v56, %v4759_v46 }
 0x304   : > { %4734 = vst [vmem:[%s7348_s12 + $0x38] sm:$0xff] %v4726_v21  ;;  %v4761_v60 = vmul.f32 %v4726_v21, %v4726_v21 }
 0x305   : > { %v4741_v11 = vadd.f32 %v4740_v26, %v4726_v21  ;;  %v4767_v51 = vadd.f32 %v4766_v19, %v4760_v23 }
 0x307   : > { %4742 = vadd.xlane.f32.xlu1 %v4741_v11  ;;  %v4768_v25 = vadd.f32 %v4767_v51, %v4761_v60 }
 0x309   : > { %4769 = vadd.xlane.f32.xlu0 %v4768_v25 }
 0x394   : > { %v4743_v37 = vpop.xlane.xlu1 %4742 }
 0x395   : > { %v4750_v5 = vrot.slane %v4743_v37, %v4749_v52 }
 0x396   : > { %v4770_v17 = vpop.xlane.xlu0 %4769 }
 0x397   : > { %4753 = vst.msk [vmem:[%s262_s15] sm:$0x1] %vm4752_vm10, %v4750_v5  ;;  %v4775_v43 = vrot.slane %v4770_v17, %v4749_v52 }
 0x399   : > { %4777 = vst.msk [vmem:[%s262_s15 + $0x1] sm:$0x1] %vm4752_vm10, %v4775_v43 }
 0x39a PF: > { %s17_s21 = sadd.s32 1, %s5636_s21  }
 0x39b   : > { %p14_p4 = scmp.ge.s32.totalorder %s17_s21, 4  }
 0x39d   :  { %16 = sbr.rel (!%p14_p4) target bundleno = 1 (0x1), region = 98 }

</bundles_post_ra>
